<compile_context>
chip_gen: v6e
topology: v6e:2x2x1
jax: 0.10.0
libtpu: 0.0.40
codegen_flags: <defaults>
</compile_context>

<pallas_src>
import functools
import math

import jax
import jax.numpy as jnp
import numpy as np
from jax import lax
from jax.experimental import pallas as pl
from jax.experimental.pallas import tpu as pltpu

_NORM_EPS = 1e-12  # F.normalize clamp


def _round_up(v, m):
    return ((v + m - 1) // m) * m


def _pad2(a, r0, r1):
    """Pad a 2-D array up to (r0, r1) only if needed (avoid no-op HBM copies)."""
    p0, p1 = r0 - a.shape[0], r1 - a.shape[1]
    if p0 == 0 and p1 == 0:
        return a
    return jnp.pad(a, ((0, p0), (0, p1)))


def _pick_bn(n, x_item_bytes, *, max_bn=8, target_bytes=2 << 20):
    """Largest divisor of n, capped by max_bn and a ~2 MiB per-step x block."""
    cap = max(1, min(max_bn, target_bytes // max(x_item_bytes, 1)))
    bn = 1
    for d in range(1, min(n, cap) + 1):
        if n % d == 0:
            bn = d
    return bn


def _netvlad_kernel(x_ref, m_ref, cb_ref, wc_ref, bc_ref, out_ref, *,
                    s_valid, s_pad, matmul_dtype):
    m = m_ref[...]            # (Kp, Cp)  matmul_dtype (cast in wrapper)
    cb = cb_ref[...]          # (Kp, 1)   fp32
    wc = wc_ref[...]          # (Dp, Cp)  matmul_dtype (cast in wrapper)
    bc = bc_ref[...]          # (Dp, 1)   fp32

    bn = x_ref.shape[0]
    for b in range(bn):       # fully unrolled; bn is small and static
        x = x_ref[b].astype(jnp.float32)                        # (Cp, Sp)

        # descriptor-wise L2 normalization over channels: x / max(||x||, eps)
        sumsq = jnp.sum(x * x, axis=0, keepdims=True)            # (1, Sp)
        xn = x * lax.rsqrt(jnp.maximum(sumsq, _NORM_EPS * _NORM_EPS))
        xn_mm = xn.astype(matmul_dtype)

        # similarity logits: w = (cn @ wc) @ xn + cn @ bc  (MXU, contracts C)
        # (independent of f -> overlaps with the conv matmul below)
        w = jnp.dot(m, xn_mm, preferred_element_type=jnp.float32) + cb  # (Kp, Sp)

        # 1x1 conv == channel matmul (MXU); materialize f once, in matmul_dtype
        f = (jnp.dot(wc, xn_mm, preferred_element_type=jnp.float32)
             + bc).astype(matmul_dtype)                           # (Dp, Sp)

        # mask padded spatial columns out of the softmax (skipped if aligned)
        if s_pad != s_valid:
            col = lax.broadcasted_iota(jnp.int32, (1, s_pad), 1)
            w = jnp.where(col < s_valid, w, -1e30)

        # numerically-stable softmax over the spatial axis
        w_max = jnp.max(w, axis=-1, keepdims=True)
        e = jnp.exp(w - w_max)                                    # (Kp, Sp)
        inv_den = pl.reciprocal(jnp.sum(e, axis=-1, keepdims=True),
                                approx=True)                      # (Kp, 1) EUP

        # vlad[k, d] = (sum_s e[k, s] * f[d, s]) * inv_den[k] — NT matmul over S
        num = lax.dot_general(e.astype(matmul_dtype), f,
                              (((1,), (1,)), ((), ())),
                              preferred_element_type=jnp.float32)  # (Kp, Dp)
        out_ref[b] = num * inv_den


def netvlad_forward(x_nchw, params, *, matmul_dtype=jnp.bfloat16,
                    x_dtype=jnp.float32):
    N, C, H, W = x_nchw.shape
    S = H * W
    wc = params['wc']             # (D, C)  1x1 conv weight
    bc = params['bc']             # (D,)    conv bias
    cent = params['centroids']    # (K, D)
    D, K = wc.shape[0], cent.shape[0]
    hi = jax.lax.Precision.HIGHEST

    # hoisted, loop-invariant: L2-normalize centroids and fold them into the
    # similarity operands once (fp32, HIGHEST), then cast to matmul_dtype.
    cn = cent / jnp.maximum(
        jnp.sqrt(jnp.sum(cent * cent, axis=1, keepdims=True)), _NORM_EPS)
    m = jnp.dot(cn, wc, precision=hi)                     # (K, C)
    cb = jnp.dot(cn, bc.reshape(D, 1), precision=hi)      # (K, 1)

    # pad to TPU-friendly shapes (lane dims -> x128, sublane dims -> x8),
    # but only when actually required.
    Sp = _round_up(S, 128)
    Dp = _round_up(D, 128)
    Kp = _round_up(K, 8)
    Cp = _round_up(C, 8)

    x_ncs = x_nchw.reshape(N, C, S)
    if (Cp, Sp) != (C, S):
        x_ncs = jnp.pad(x_ncs, ((0, 0), (0, Cp - C), (0, Sp - S)))
    x_p = x_ncs.astype(x_dtype)

    m_p = _pad2(m, Kp, Cp).astype(matmul_dtype)
    cb_p = _pad2(cb, Kp, 1)
    wc_p = _pad2(wc, Dp, Cp).astype(matmul_dtype)
    bc_p = _pad2(bc.reshape(D, 1), Dp, 1)

    # batch items per grid step: largest divisor of N with ~2 MiB x block
    x_item_bytes = Cp * Sp * jnp.dtype(x_dtype).itemsize
    bn = _pick_bn(N, x_item_bytes)
    grid = (N // bn,)

    kernel = functools.partial(_netvlad_kernel, s_valid=S, s_pad=Sp,
                               matmul_dtype=matmul_dtype)

    out = pl.pallas_call(
        kernel,
        out_shape=jax.ShapeDtypeStruct((N, Kp, Dp), jnp.float32),
        grid=grid,
        in_specs=[
            # TODO(synk): pipeline_mode=pl.Buffered(3) on x if the DMA is still
            # exposed on v5e after batching.
            pl.BlockSpec((bn, Cp, Sp), lambda n: (n, 0, 0)),   # x
            pl.BlockSpec((Kp, Cp), lambda n: (0, 0)),          # M = cn @ wc
            pl.BlockSpec((Kp, 1), lambda n: (0, 0)),           # cb = cn @ bc
            pl.BlockSpec((Dp, Cp), lambda n: (0, 0)),          # conv weight
            pl.BlockSpec((Dp, 1), lambda n: (0, 0)),           # conv bias
        ],
        out_specs=pl.BlockSpec((bn, Kp, Dp), lambda n: (n, 0, 0)),
        compiler_params=pltpu.CompilerParams(
            dimension_semantics=("parallel",),
            # peak in-kernel footprint is a few MiB; 32 MiB is within the
            # scoped budget on every generation (incl. v7x's 64 MiB VMEM).
            vmem_limit_bytes=32 * 1024 * 1024,
        ),
    )(x_p, m_p, cb_p, wc_p, bc_p)

    if (Kp, Dp) != (K, D):
        out = out[:, :K, :D]
    return out


def netvlad_reference(x_nchw, p):
    """Pure-JAX reference mirroring the PyTorch NetVLAD_V2 forward."""
    N, C, H, W = x_nchw.shape
    S = H * W
    hi = jax.lax.Precision.HIGHEST
    norm = jnp.sqrt(jnp.sum(x_nchw * x_nchw, axis=1, keepdims=True))
    xn = x_nchw / jnp.maximum(norm, _NORM_EPS)
    x_flat = xn.reshape(N, C, S)
    f = jnp.einsum('dc,ncs->nds', p['wc'], x_flat, precision=hi) \
        + p['bc'][None, :, None]
    cnorm = jnp.sqrt(jnp.sum(p['centroids'] ** 2, axis=1, keepdims=True))
    cn = p['centroids'] / jnp.maximum(cnorm, _NORM_EPS)
    w = jnp.einsum('kd,nds->nks', cn, f, precision=hi)
    sa = jax.nn.softmax(w, axis=-1)
    return jnp.einsum('nks,nds->nkd', sa, f, precision=hi)


def init_params(key, *, num_clusters, dim, dim_center):
    """Deterministic synthetic parameters (shapes/init from NetVLAD_V2.__init__)."""
    k1, k2 = jax.random.split(key)
    # conv 1x1: kaiming_normal(mode='fan_out') -> std = sqrt(2 / dim_center); bias = 0
    wc = jax.random.normal(k1, (dim_center, dim), jnp.float32) * math.sqrt(2.0 / dim_center)
    centroids = jax.random.uniform(k2, (num_clusters, dim_center), dtype=jnp.float32)
    return dict(wc=wc,
                bc=jnp.zeros((dim_center,), jnp.float32),
                centroids=centroids)


if __name__ == "__main__":
    key = jax.random.PRNGKey(0)
    kx, kp = jax.random.split(key)

    # small but lane-friendly shapes: N=2, dim(C)=128, H=W=16 (S=256),
    # num_clusters(K)=16, dim_center(D)=256
    N, C, H, W = 2, 128, 16, 16
    K, D = 16, 256
    params = init_params(kp, num_clusters=K, dim=C, dim_center=D)
    x = jax.random.normal(kx, (N, C, H, W), jnp.float32)

    # default (bf16 matmul operands, fp32 accumulation) path
    out = netvlad_forward(x, params)
    jax.block_until_ready(out)
    assert out.shape == (N, K, D), out.shape

    ref = netvlad_reference(x, params)

    # tight semantic check with fp32 matmul operands (only approx-reciprocal /
    # rsqrt ULP-level differences remain)
    out_f32 = netvlad_forward(x, params, matmul_dtype=jnp.float32)
    jax.block_until_ready(out_f32)
    np.testing.assert_allclose(np.asarray(out_f32), np.asarray(ref),
                               rtol=3e-3, atol=1e-3)

    # default bf16 path: expected ~1e-3..1e-2 quantization error vs the
    # HIGHEST-precision fp32 reference (not a kernel bug)
    np.testing.assert_allclose(np.asarray(out), np.asarray(ref),
                               rtol=5e-2, atol=1e-2)
    print("KERNEL_OK")
</pallas_src>

<mosaic_0001>
module attributes {stable_mosaic.version = 11 : i64} {
  func.func @_netvlad_kernel(%arg0: i32, %arg1: memref<2x128x256xf32, #tpu.memory_space<vmem>>, %arg2: memref<16x128xbf16, #tpu.memory_space<vmem>>, %arg3: memref<16x1xf32, #tpu.memory_space<vmem>>, %arg4: memref<256x128xbf16, #tpu.memory_space<vmem>>, %arg5: memref<256x1xf32, #tpu.memory_space<vmem>>, %arg6: memref<2x16x256xf32, #tpu.memory_space<vmem>>) attributes {dimension_semantics = [#tpu.dimension_semantics<parallel>], iteration_bounds = array<i64: 1>, scalar_prefetch = 0 : i64, scratch_operands = 0 : i64, tpu.core_type = #tpu.core_type<tc>, window_params = [{transform_indices = @transform_0, window_bounds = array<i64: 2, 128, 256>}, {pipeline_mode = #tpu.pipeline_mode<synchronous>, transform_indices = @transform_1, window_bounds = array<i64: 16, 128>}, {pipeline_mode = #tpu.pipeline_mode<synchronous>, transform_indices = @transform_2, window_bounds = array<i64: 16, 1>}, {pipeline_mode = #tpu.pipeline_mode<synchronous>, transform_indices = @transform_3, window_bounds = array<i64: 256, 128>}, {pipeline_mode = #tpu.pipeline_mode<synchronous>, transform_indices = @transform_4, window_bounds = array<i64: 256, 1>}, {transform_indices = @transform_5, window_bounds = array<i64: 2, 16, 256>}]} {
    %c0 = arith.constant 0 : index
    %c0_0 = arith.constant 0 : index
    %0 = vector.load %arg2[%c0, %c0_0] : memref<16x128xbf16, #tpu.memory_space<vmem>>, vector<16x128xbf16>
    %c0_1 = arith.constant 0 : index
    %c0_2 = arith.constant 0 : index
    %1 = vector.load %arg3[%c0_1, %c0_2] : memref<16x1xf32, #tpu.memory_space<vmem>>, vector<16x1xf32>
    %c0_3 = arith.constant 0 : index
    %c0_4 = arith.constant 0 : index
    %2 = vector.load %arg4[%c0_3, %c0_4] : memref<256x128xbf16, #tpu.memory_space<vmem>>, vector<256x128xbf16>
    %c0_5 = arith.constant 0 : index
    %c0_6 = arith.constant 0 : index
    %3 = vector.load %arg5[%c0_5, %c0_6] : memref<256x1xf32, #tpu.memory_space<vmem>>, vector<256x1xf32>
    %c0_7 = arith.constant 0 : index
    %c0_8 = arith.constant 0 : index
    %c0_9 = arith.constant 0 : index
    %4 = vector.load %arg1[%c0_7, %c0_8, %c0_9] : memref<2x128x256xf32, #tpu.memory_space<vmem>>, vector<1x128x256xf32>
    %5 = vector.shape_cast %4 : vector<1x128x256xf32> to vector<128x256xf32>
    %6 = arith.mulf %5, %5 : vector<128x256xf32>
    %cst = arith.constant dense<0.000000e+00> : vector<256xf32>
    %7 = vector.multi_reduction <add>, %6, %cst [0] : vector<128x256xf32> to vector<256xf32>
    %8 = vector.shape_cast %7 : vector<256xf32> to vector<1x256xf32>
    %cst_10 = arith.constant 1.000000e-24 : f32
    %9 = vector.broadcast %cst_10 : f32 to vector<1x256xf32>
    %10 = arith.maximumf %8, %9 : vector<1x256xf32>
    %11 = math.rsqrt %10 : vector<1x256xf32>
    %12 = vector.broadcast %11 : vector<1x256xf32> to vector<128x256xf32>
    %13 = arith.mulf %5, %12 : vector<128x256xf32>
    %14 = arith.truncf %13 : vector<128x256xf32> to vector<128x256xbf16>
    %cst_11 = arith.constant dense<0.000000e+00> : vector<16x256xf32>
    %15 = tpu.matmul %0, %14, %cst_11 {dimension_numbers = #tpu.dot_dimension_numbers<[1], [0], [0], [1], [0, 0, 1, 1], [], []>} : vector<16x128xbf16>, vector<128x256xbf16>, vector<16x256xf32> -> vector<16x256xf32>
    %16 = vector.broadcast %1 : vector<16x1xf32> to vector<16x256xf32>
    %17 = arith.addf %15, %16 : vector<16x256xf32>
    %cst_12 = arith.constant dense<0.000000e+00> : vector<256x256xf32>
    %18 = tpu.matmul %2, %14, %cst_12 {dimension_numbers = #tpu.dot_dimension_numbers<[1], [0], [0], [1], [0, 0, 1, 1], [], []>} : vector<256x128xbf16>, vector<128x256xbf16>, vector<256x256xf32> -> vector<256x256xf32>
    %19 = vector.broadcast %3 : vector<256x1xf32> to vector<256x256xf32>
    %20 = arith.addf %18, %19 : vector<256x256xf32>
    %21 = arith.truncf %20 : vector<256x256xf32> to vector<256x256xbf16>
    %cst_13 = arith.constant dense<0xFF800000> : vector<16xf32>
    %22 = vector.multi_reduction <maximumf>, %17, %cst_13 [1] : vector<16x256xf32> to vector<16xf32>
    %23 = vector.shape_cast %22 : vector<16xf32> to vector<16x1xf32>
    %24 = vector.broadcast %23 : vector<16x1xf32> to vector<16x256xf32>
    %25 = arith.subf %17, %24 : vector<16x256xf32>
    %26 = math.exp %25 : vector<16x256xf32>
    %cst_14 = arith.constant dense<0.000000e+00> : vector<16xf32>
    %27 = vector.multi_reduction <add>, %26, %cst_14 [1] : vector<16x256xf32> to vector<16xf32>
    %28 = vector.shape_cast %27 : vector<16xf32> to vector<16x1xf32>
    %29 = tpu.reciprocal %28 {approx = true} : vector<16x1xf32> -> vector<16x1xf32>
    %30 = arith.truncf %26 : vector<16x256xf32> to vector<16x256xbf16>
    %cst_15 = arith.constant dense<0.000000e+00> : vector<16x256xf32>
    %31 = tpu.matmul %30, %21, %cst_15 {dimension_numbers = #tpu.dot_dimension_numbers<[1], [1], [0], [0], [0, 0, 1, 0], [], []>} : vector<16x256xbf16>, vector<256x256xbf16>, vector<16x256xf32> -> vector<16x256xf32>
    %32 = vector.broadcast %29 : vector<16x1xf32> to vector<16x256xf32>
    %33 = arith.mulf %31, %32 : vector<16x256xf32>
    %c0_16 = arith.constant 0 : index
    %c0_17 = arith.constant 0 : index
    %c0_18 = arith.constant 0 : index
    %34 = vector.load %arg6[%c0_16, %c0_17, %c0_18] : memref<2x16x256xf32, #tpu.memory_space<vmem>>, vector<1x16x256xf32>
    %35 = vector.shape_cast %34 : vector<1x16x256xf32> to vector<16x256xf32>
    %36 = vector.shape_cast %33 : vector<16x256xf32> to vector<1x16x256xf32>
    tpu.vector_store %arg6[%c0_16, %c0_17, %c0_18], %36 {strides = array<i32>} : memref<2x16x256xf32, #tpu.memory_space<vmem>>, vector<1x16x256xf32>,
    %c1 = arith.constant 1 : index
    %c0_19 = arith.constant 0 : index
    %c0_20 = arith.constant 0 : index
    %37 = vector.load %arg1[%c1, %c0_19, %c0_20] : memref<2x128x256xf32, #tpu.memory_space<vmem>>, vector<1x128x256xf32>
    %38 = vector.shape_cast %37 : vector<1x128x256xf32> to vector<128x256xf32>
    %39 = arith.mulf %38, %38 : vector<128x256xf32>
    %cst_21 = arith.constant dense<0.000000e+00> : vector<256xf32>
    %40 = vector.multi_reduction <add>, %39, %cst_21 [0] : vector<128x256xf32> to vector<256xf32>
    %41 = vector.shape_cast %40 : vector<256xf32> to vector<1x256xf32>
    %cst_22 = arith.constant 1.000000e-24 : f32
    %42 = vector.broadcast %cst_22 : f32 to vector<1x256xf32>
    %43 = arith.maximumf %41, %42 : vector<1x256xf32>
    %44 = math.rsqrt %43 : vector<1x256xf32>
    %45 = vector.broadcast %44 : vector<1x256xf32> to vector<128x256xf32>
    %46 = arith.mulf %38, %45 : vector<128x256xf32>
    %47 = arith.truncf %46 : vector<128x256xf32> to vector<128x256xbf16>
    %cst_23 = arith.constant dense<0.000000e+00> : vector<16x256xf32>
    %48 = tpu.matmul %0, %47, %cst_23 {dimension_numbers = #tpu.dot_dimension_numbers<[1], [0], [0], [1], [0, 0, 1, 1], [], []>} : vector<16x128xbf16>, vector<128x256xbf16>, vector<16x256xf32> -> vector<16x256xf32>
    %49 = vector.broadcast %1 : vector<16x1xf32> to vector<16x256xf32>
    %50 = arith.addf %48, %49 : vector<16x256xf32>
    %cst_24 = arith.constant dense<0.000000e+00> : vector<256x256xf32>
    %51 = tpu.matmul %2, %47, %cst_24 {dimension_numbers = #tpu.dot_dimension_numbers<[1], [0], [0], [1], [0, 0, 1, 1], [], []>} : vector<256x128xbf16>, vector<128x256xbf16>, vector<256x256xf32> -> vector<256x256xf32>
    %52 = vector.broadcast %3 : vector<256x1xf32> to vector<256x256xf32>
    %53 = arith.addf %51, %52 : vector<256x256xf32>
    %54 = arith.truncf %53 : vector<256x256xf32> to vector<256x256xbf16>
    %cst_25 = arith.constant dense<0xFF800000> : vector<16xf32>
    %55 = vector.multi_reduction <maximumf>, %50, %cst_25 [1] : vector<16x256xf32> to vector<16xf32>
    %56 = vector.shape_cast %55 : vector<16xf32> to vector<16x1xf32>
    %57 = vector.broadcast %56 : vector<16x1xf32> to vector<16x256xf32>
    %58 = arith.subf %50, %57 : vector<16x256xf32>
    %59 = math.exp %58 : vector<16x256xf32>
    %cst_26 = arith.constant dense<0.000000e+00> : vector<16xf32>
    %60 = vector.multi_reduction <add>, %59, %cst_26 [1] : vector<16x256xf32> to vector<16xf32>
    %61 = vector.shape_cast %60 : vector<16xf32> to vector<16x1xf32>
    %62 = tpu.reciprocal %61 {approx = true} : vector<16x1xf32> -> vector<16x1xf32>
    %63 = arith.truncf %59 : vector<16x256xf32> to vector<16x256xbf16>
    %cst_27 = arith.constant dense<0.000000e+00> : vector<16x256xf32>
    %64 = tpu.matmul %63, %54, %cst_27 {dimension_numbers = #tpu.dot_dimension_numbers<[1], [1], [0], [0], [0, 0, 1, 0], [], []>} : vector<16x256xbf16>, vector<256x256xbf16>, vector<16x256xf32> -> vector<16x256xf32>
    %65 = vector.broadcast %62 : vector<16x1xf32> to vector<16x256xf32>
    %66 = arith.mulf %64, %65 : vector<16x256xf32>
    %c1_28 = arith.constant 1 : index
    %c0_29 = arith.constant 0 : index
    %c0_30 = arith.constant 0 : index
    %67 = vector.load %arg6[%c1_28, %c0_29, %c0_30] : memref<2x16x256xf32, #tpu.memory_space<vmem>>, vector<1x16x256xf32>
    %68 = vector.shape_cast %67 : vector<1x16x256xf32> to vector<16x256xf32>
    %69 = vector.shape_cast %66 : vector<16x256xf32> to vector<1x16x256xf32>
    tpu.vector_store %arg6[%c1_28, %c0_29, %c0_30], %69 {strides = array<i32>} : memref<2x16x256xf32, #tpu.memory_space<vmem>>, vector<1x16x256xf32>,
    return
  }
  func.func @transform_0(%arg0: i32) -> (i32, i32, i32) {
    %c0_i32 = arith.constant 0 : i32
    %c0_i32_0 = arith.constant 0 : i32
    %c0_i32_1 = arith.constant 0 : i32
    return %arg0, %c0_i32, %c0_i32_0 : i32, i32, i32
  }
  func.func @transform_1(%arg0: i32) -> (i32, i32) {
    %c0_i32 = arith.constant 0 : i32
    %c0_i32_0 = arith.constant 0 : i32
    %c0_i32_1 = arith.constant 0 : i32
    return %c0_i32, %c0_i32_0 : i32, i32
  }
  func.func @transform_2(%arg0: i32) -> (i32, i32) {
    %c0_i32 = arith.constant 0 : i32
    %c0_i32_0 = arith.constant 0 : i32
    %c0_i32_1 = arith.constant 0 : i32
    return %c0_i32, %c0_i32_0 : i32, i32
  }
  func.func @transform_3(%arg0: i32) -> (i32, i32) {
    %c0_i32 = arith.constant 0 : i32
    %c0_i32_0 = arith.constant 0 : i32
    %c0_i32_1 = arith.constant 0 : i32
    return %c0_i32, %c0_i32_0 : i32, i32
  }
  func.func @transform_4(%arg0: i32) -> (i32, i32) {
    %c0_i32 = arith.constant 0 : i32
    %c0_i32_0 = arith.constant 0 : i32
    %c0_i32_1 = arith.constant 0 : i32
    return %c0_i32, %c0_i32_0 : i32, i32
  }
  func.func @transform_5(%arg0: i32) -> (i32, i32, i32) {
    %c0_i32 = arith.constant 0 : i32
    %c0_i32_0 = arith.constant 0 : i32
    %c0_i32_1 = arith.constant 0 : i32
    return %arg0, %c0_i32, %c0_i32_0 : i32, i32, i32
  }
}

</mosaic_0001>

<bundles_post_ra>
// kernel: tpu_custom_call.1
= control target key start
LH: loop header
LB: loop body
LE: loop exit
PB: predicated region body
PF: predicated region fallthrough
CT: control target
= control target key end

     0   :  { %10 = vsyncpa [#allocation3], 0  ;;  %s2835_s0 = inlined_call_operand.hbm [shape: f32[2,128,256], index: 0, kind: input, shape index: {}]   ;;  %s2836_s1 = inlined_call_operand.vmem [shape: bf16[16,128], index: 1, kind: input, shape index: {}]   ;;  %s2837_s2 = inlined_call_operand.vmem [shape: f32[16,1], index: 2, kind: input, shape index: {}]   ;;  %s2838_s3 = inlined_call_operand.vmem [shape: bf16[256,128], index: 3, kind: input, shape index: {}]   ;;  %s2839_s4 = inlined_call_operand.vmem [shape: f32[256,1], index: 4, kind: input, shape index: {}]   ;;  %s2840_s5 = inlined_call_operand.hbm [shape: f32[2,16,256], index: 5, kind: output, shape index: {}]  }
   0x1   :  { %11 = vsyncpa [#allocation4], 0  ;;  %s1522_s18 = smov [#allocation2]  }
   0x2   :  { %s17_s19 = sshll.u32 %s1522_s18, 4  ;;  %s18_s19 = int_to_ptr.vmem [resolvable:$true] %s17_s19 }
   0x3   :  { %s1486_s20 = scalar_lea.vmem %s18_s19, 8192  ;;  %p1491_p1 = scmp.lt.s32.totalorder %s18_s19, %s18_s19 }
   0x4   :  { %p1487_p0 = scmp.ne.s32.totalorder %s18_s19, %s1486_s20  ;;  %p1492_p2 = scmp.lt.s32.totalorder %s1486_s20, %s1486_s20 }
   0x6   :  { %p1493_p3 = por %p1492_p2, %p1491_p1 }
   0x8   :  { %p1494_p4 = pnand %p1493_p3, %p1487_p0 }
   0xa   :  { %1497 = shalt.err (!%p1494_p4)
}
   0xb   :  { %s1523_s21 = smov 256   ;;  %s1524_s22 = smov 16  }
   0xc   :  { %23 = dma.hbm_to_vmem [thread:$0]  %s2835_s0, 8192, %s18_s19, [#allocation3], %s1523_s21, %s1523_s21, %s1524_s22  }
   0xd   :  { %1518 = dma.done.wait [#allocation3], 8192  }
   0xe   :  { %1519 = vsyncadd [#allocation3], 4294959104  ;;  %v2841_v0 = vmov 0   ;;  %v1567_v1 = vld [vmem:[#allocation2 + $0x8] sm:$0xff]  ;;  %v1569_v2 = vld [vmem:[#allocation2 + $0x18] sm:$0xff] }
   0xf   :  { %310 = vmatprep.mubr.bf16.mxu0 %v2841_v0  ;;  %609 = vmatprep.mubr.bf16.mxu1 %v2841_v0  ;;  %v1571_v3 = vld [vmem:[#allocation2 + $0x28] sm:$0xff]  ;;  %v1573_v4 = vld [vmem:[#allocation2 + $0x38] sm:$0xff]  ;;  %v137_v5 = vmul.f32 %v1567_v1, %v1567_v1  ;;  %v139_v6 = vmul.f32 %v1569_v2, %v1569_v2  ;;  %v1589_v14 = vld [vmem:[#allocation2] sm:$0xff] }
  0x10   :  { %1428 = vset.pattern.permute.xlu1 %v2841_v0  ;;  %1427 = vset.pattern.permute.xlu0 %v2841_v0  ;;  %v141_v7 = vmul.f32 %v1571_v3, %v1571_v3  ;;  %v1581_v8 = vld [vmem:[#allocation2 + $0x48] sm:$0xff]  ;;  %v143_v9 = vmul.f32 %v1573_v4, %v1573_v4  ;;  %v1585_v11 = vld [vmem:[#allocation2 + $0x58] sm:$0xff]  ;;  %v1591_v15 = vld [vmem:[#allocation2 + $0x10] sm:$0xff]  ;;  %v136_v19 = vmul.f32 %v1589_v14, %v1589_v14 }
  0x11   :  { %v189_v10 = vadd.f32 %v139_v6, %v137_v5  ;;  %v145_v12 = vmul.f32 %v1581_v8, %v1581_v8  ;;  %v1593_v16 = vld [vmem:[#allocation2 + $0x68] sm:$0xff]  ;;  %v1595_v17 = vld [vmem:[#allocation2 + $0x20] sm:$0xff]  ;;  %v1597_v18 = vld [vmem:[#allocation2 + $0x30] sm:$0xff]  ;;  %v138_v20 = vmul.f32 %v1591_v15, %v1591_v15  ;;  %v147_v21 = vmul.f32 %v1585_v11, %v1585_v11 }
  0x12   :  { %v1605_v23 = vld [vmem:[#allocation2 + $0x40] sm:$0xff]  ;;  %v140_v24 = vmul.f32 %v1595_v17, %v1595_v17  ;;  %v1609_v25 = vld [vmem:[#allocation2 + $0x78] sm:$0xff]  ;;  %v142_v26 = vmul.f32 %v1597_v18, %v1597_v18  ;;  %v149_v28 = vmul.f32 %v1593_v16, %v1593_v16  ;;  %v1615_v30 = vld [vmem:[#allocation2 + $0x50] sm:$0xff] }
  0x13   :  { %v190_v13 = vadd.f32 %v189_v10, %v141_v7  ;;  %v168_v27 = vadd.f32 %v138_v20, %v136_v19  ;;  %v1617_v31 = vld [vmem:[#allocation2 + $0x88] sm:$0xff]  ;;  %v1619_v32 = vld [vmem:[#allocation2 + $0x98] sm:$0xff]  ;;  %v144_v33 = vmul.f32 %v1605_v23, %v1605_v23  ;;  %v151_v35 = vmul.f32 %v1609_v25, %v1609_v25  ;;  %v1625_v37 = vld [vmem:[#allocation2 + $0x60] sm:$0xff] }
  0x14   :  { %v1627_v38 = vld [vmem:[#allocation2 + $0xa8] sm:$0xff]  ;;  %v146_v39 = vmul.f32 %v1615_v30, %v1615_v30  ;;  %v153_v41 = vmul.f32 %v1617_v31, %v1617_v31  ;;  %v1633_v43 = vld [vmem:[#allocation2 + $0x70] sm:$0xff]  ;;  %v1635_v44 = vld [vmem:[#allocation2 + $0x80] sm:$0xff]  ;;  %v148_v45 = vmul.f32 %v1625_v37, %v1625_v37  ;;  %v155_v48 = vmul.f32 %v1619_v32, %v1619_v32 }
  0x15   :  { %v191_v22 = vadd.f32 %v190_v13, %v143_v9  ;;  %v169_v34 = vadd.f32 %v168_v27, %v140_v24  ;;  %v86_v47 = vld [vmem:[%s2839_s4 + $0x70] sm:$0xff]  ;;  %v84_v50 = vld [vmem:[%s2839_s4 + $0x60] sm:$0xff]  ;;  %v1647_v51 = vld [vmem:[#allocation2 + $0xb8] sm:$0xff]  ;;  %v150_v52 = vmul.f32 %v1633_v43, %v1633_v43  ;;  %v157_v55 = vmul.f32 %v1627_v38, %v1627_v38 }
  0x16   :  { %393 = vperm.xlu0 %1427, %v86_v47   ;;  %383 = vperm.xlu1 %1428, %v84_v50   ;;  %v87_v54 = vld [vmem:[%s2839_s4 + $0x78] sm:$0xff]  ;;  %v1656_v57 = vld [vmem:[#allocation2 + $0x90] sm:$0xff]  ;;  %v85_v58 = vld [vmem:[%s2839_s4 + $0x68] sm:$0xff]  ;;  %v152_v60 = vmul.f32 %v1635_v44, %v1635_v44  ;;  %v159_v63 = vmul.f32 %v1647_v51, %v1647_v51 }
  0x17   :  { %v192_v29 = vadd.f32 %v191_v22, %v145_v12  ;;  %v170_v40 = vadd.f32 %v169_v34, %v142_v26  ;;  %v1661_v59 = vld [vmem:[#allocation2 + $0xc8] sm:$0xff]  ;;  %v1665_v62 = vld [vmem:[#allocation2 + $0xd8] sm:$0xff]  ;;  %v1669_v6 = vld [vmem:[#allocation2 + $0xa0] sm:$0xff]  ;;  %v154_v7 = vmul.f32 %v1656_v57, %v1656_v57 }
  0x18   :  { %v82_v10 = vld [vmem:[%s2839_s4 + $0x50] sm:$0xff]  ;;  %v161_v12 = vmul.f32 %v1661_v59, %v1661_v59  ;;  %v83_v20 = vld [vmem:[%s2839_s4 + $0x58] sm:$0xff]  ;;  %v156_v22 = vmul.f32 %v1669_v6, %v1669_v6  ;;  %v163_v27 = vmul.f32 %v1665_v62, %v1665_v62 }
  0x19   :  { %v193_v36 = vadd.f32 %v192_v29, %v147_v21  ;;  %v171_v46 = vadd.f32 %v170_v40, %v144_v33  ;;  %v1678_v19 = vld [vmem:[#allocation2 + $0xb0] sm:$0xff]  ;;  %v1683_v21 = vld [vmem:[#allocation2 + $0xe8] sm:$0xff]  ;;  %v1687_v26 = vld [vmem:[#allocation2 + $0xf8] sm:$0xff] }
  0x1a   :  { %398 = vperm.xlu0 %1427, %v87_v54   ;;  %388 = vperm.xlu1 %1428, %v85_v58   ;;  %v1691_v29 = vld [vmem:[#allocation2 + $0xc0] sm:$0xff]  ;;  %v1693_v33 = vld [vmem:[#allocation2 + $0xd0] sm:$0xff]  ;;  %v158_v34 = vmul.f32 %v1678_v19, %v1678_v19 }
  0x1b   :  { %v194_v42 = vadd.f32 %v193_v36, %v149_v28  ;;  %v172_v53 = vadd.f32 %v171_v46, %v146_v39  ;;  %v80_v36 = vld [vmem:[%s2839_s4 + $0x40] sm:$0xff]  ;;  %v165_v39 = vmul.f32 %v1683_v21, %v1683_v21  ;;  %v78_v47 = vld [vmem:[%s2839_s4 + $0x30] sm:$0xff]  ;;  %v162_v50 = vmul.f32 %v1693_v33, %v1693_v33 }
  0x1c   :  { %v1716_v54 = vld [vmem:[#allocation2 + $0xf0] sm:$0xff] }
  0x1d   :  { %v195_v49 = vadd.f32 %v194_v42, %v151_v35  ;;  %v173_v61 = vadd.f32 %v172_v53, %v148_v45  ;;  %v81_v42 = vld [vmem:[%s2839_s4 + $0x48] sm:$0xff]  ;;  %v160_v45 = vmul.f32 %v1691_v29, %v1691_v29 }
  0x1e   :  { %373 = vperm.xlu0 %1427, %v82_v10   ;;  %378 = vperm.xlu1 %1428, %v83_v20   ;;  %v1732_v10 = vld [vmem:[#allocation2 + $0x128] sm:$0xff]  ;;  %v1737_v20 = vld [vmem:[#allocation2 + $0x138] sm:$0xff] }
  0x1f   :  { %v196_v56 = vadd.f32 %v195_v49, %v153_v41  ;;  %v174_v9 = vadd.f32 %v173_v61, %v150_v52  ;;  %v1702_v41 = vld [vmem:[#allocation2 + $0xe0] sm:$0xff]  ;;  %2924 = vst [vmem:[#allocation10_spill] sm:$0xff] %v1732_v10  ;;  %2925 = vst [vmem:[#allocation11_spill] sm:$0xff] %v1737_v20 }
  0x21   :  { %v197_v5 = vadd.f32 %v196_v56, %v155_v48  ;;  %v175_v24 = vadd.f32 %v174_v9, %v152_v60  ;;  %v167_v48 = vmul.f32 %v1687_v26, %v1687_v26  ;;  %v164_v56 = vmul.f32 %v1702_v41, %v1702_v41  ;;  %v1723_v60 = vld [vmem:[#allocation2 + $0x108] sm:$0xff]  ;;  %v38_v9 = vld [vmem:[%s2837_s2] sm:$0xff] }
  0x22   :  { %363 = vperm.xlu0 %1427, %v80_v36   ;;  %368 = vperm.xlu1 %1428, %v81_v42   ;;  %2922 = vst [vmem:[#allocation8_spill] sm:$0xff] %v1723_v60  ;;  %v1752_v42 = vld [vmem:[#allocation2 + $0x100] sm:$0xff] }
  0x23   :  { %v198_v13 = vadd.f32 %v197_v5, %v157_v55  ;;  %v176_v35 = vadd.f32 %v175_v24, %v154_v7  ;;  %v79_v55 = vld [vmem:[%s2839_s4 + $0x38] sm:$0xff]  ;;  %v166_v5 = vmul.f32 %v1716_v54, %v1716_v54  ;;  %2927 = vst [vmem:[#allocation13_spill] sm:$0xff] %v1752_v42 }
  0x25   :  { %v199_v28 = vadd.f32 %v198_v13, %v159_v63  ;;  %v177_v46 = vadd.f32 %v176_v35, %v156_v22  ;;  %v1725_v63 = vld [vmem:[#allocation2 + $0x118] sm:$0xff]  ;;  %v39_v13 = vld [vmem:[%s2837_s2 + $0x8] sm:$0xff]  ;;  %v915_v22 = vmul.f32 %v1723_v60, %v1723_v60  ;;  %v919_v35 = vmul.f32 %v1732_v10, %v1732_v10 }
  0x26   :  { %353 = vperm.xlu0 %1427, %v78_v47   ;;  %2923 = vst [vmem:[#allocation9_spill] sm:$0xff] %v1725_v63  ;;  %358 = vperm.xlu1 %1428, %v79_v55   ;;  %v917_v24 = vmul.f32 %v1725_v63, %v1725_v63  ;;  %v77_v47 = vld [vmem:[%s2839_s4 + $0x28] sm:$0xff]  ;;  %v1765_v55 = vld [vmem:[#allocation2 + $0x158] sm:$0xff] }
  0x27   :  { %v200_v40 = vadd.f32 %v199_v28, %v161_v12  ;;  %v178_v52 = vadd.f32 %v177_v46, %v158_v34  ;;  %v76_v34 = vld [vmem:[%s2839_s4 + $0x20] sm:$0xff]  ;;  %2930 = vst [vmem:[#allocation16_spill] sm:$0xff] %v1765_v55  ;;  %v73_v60 = vld [vmem:[%s2839_s4 + $0x8] sm:$0xff] }
  0x29   :  { %v201_v49 = vadd.f32 %v200_v40, %v163_v27  ;;  %v179_v58 = vadd.f32 %v178_v52, %v160_v45  ;;  %v921_v40 = vmul.f32 %v1737_v20, %v1737_v20  ;;  %v1754_v45 = vld [vmem:[#allocation2 + $0x110] sm:$0xff] }
  0x2a   :  { %264 = vperm.xlu0 %1427, %v38_v9   ;;  %269 = vperm.xlu1 %1428, %v39_v13   ;;  %2928 = vst [vmem:[#allocation14_spill] sm:$0xff] %v1754_v45  ;;  %v916_v52 = vmul.f32 %v1754_v45, %v1754_v45  ;;  %v74_v9 = vld [vmem:[%s2839_s4 + $0x10] sm:$0xff] }
  0x2b   :  { %v202_v53 = vadd.f32 %v201_v49, %v165_v39  ;;  %v180_v7 = vadd.f32 %v179_v58, %v162_v50  ;;  %v1748_v39 = vld [vmem:[#allocation2 + $0x148] sm:$0xff]  ;;  %v1759_v49 = vld [vmem:[#allocation2 + $0x120] sm:$0xff]  ;;  %v914_v50 = vmul.f32 %v1752_v42, %v1752_v42 }
  0x2c   :  { %2926 = vst [vmem:[#allocation12_spill] sm:$0xff] %v1748_v39  ;;  %2929 = vst [vmem:[#allocation15_spill] sm:$0xff] %v1759_v49  ;;  %v923_v58 = vmul.f32 %v1748_v39, %v1748_v39  ;;  %v918_v13 = vmul.f32 %v1759_v49, %v1759_v49  ;;  %v1807_v49 = vld [vmem:[#allocation2 + $0x198] sm:$0xff] }
  0x2d   :  { %v203_v61 = vadd.f32 %v202_v53, %v167_v48  ;;  %v181_v27 = vadd.f32 %v180_v7, %v164_v56  ;;  %v967_v48 = vadd.f32 %v917_v24, %v915_v22  ;;  %v946_v22 = vadd.f32 %v916_v52, %v914_v50  ;;  %v1792_v50 = vld [vmem:[#allocation2 + $0x150] sm:$0xff] }
  0x2e   :  { %343 = vperm.xlu0 %1427, %v76_v34   ;;  %348 = vperm.xlu1 %1428, %v77_v47   ;;  %v1788_v47 = vld [vmem:[#allocation2 + $0x178] sm:$0xff]  ;;  %2933 = vst [vmem:[#allocation19_spill] sm:$0xff] %v1792_v50 }
  0x2f   :  { %v204_v12 = vrot.slane %v203_v61, 4  ;;  %v182_v36 = vadd.f32 %v181_v27, %v166_v5  ;;  %v1769_v5 = vld [vmem:[#allocation2 + $0x130] sm:$0xff]  ;;  %v75_v27 = vld [vmem:[%s2839_s4 + $0x18] sm:$0xff]  ;;  %v947_v42 = vadd.f32 %v946_v22, %v918_v13 }
  0x30   :  { %2931 = vst [vmem:[#allocation17_spill] sm:$0xff] %v1769_v5  ;;  %v920_v52 = vmul.f32 %v1769_v5, %v1769_v5  ;;  %v929_v5 = vmul.f32 %v1788_v47, %v1788_v47 }
  0x31   :  { %v205_v28 = vadd.f32 %v204_v12, %v203_v61  ;;  %v183_v53 = vrot.slane %v182_v36, 4  ;;  %v968_v61 = vadd.f32 %v967_v48, %v919_v35  ;;  %v1774_v12 = vld [vmem:[#allocation2 + $0x168] sm:$0xff]  ;;  %v1783_v35 = vld [vmem:[#allocation2 + $0x140] sm:$0xff] }
  0x32   :  { %2932 = vst [vmem:[#allocation18_spill] sm:$0xff] %v1783_v35  ;;  %v1790_v48 = vld [vmem:[#allocation2 + $0x188] sm:$0xff]  ;;  %333 = vperm.xlu0 %1427, %v74_v9   ;;  %338 = vperm.xlu1 %1428, %v75_v27   ;;  %v922_v45 = vmul.f32 %v1783_v35, %v1783_v35  ;;  %v1805_v9 = vld [vmem:[#allocation2 + $0x160] sm:$0xff]  ;;  %v1813_v27 = vld [vmem:[#allocation2 + $0x170] sm:$0xff] }
  0x33   :  { %v206_v46 = vrot.slane %v205_v28, 2  ;;  %v184_v7 = vadd.f32 %v183_v53, %v182_v36  ;;  %v969_v34 = vadd.f32 %v968_v61, %v921_v40  ;;  %v927_v40 = vmul.f32 %v1774_v12, %v1774_v12  ;;  %2934 = vst [vmem:[#allocation20_spill] sm:$0xff] %v1813_v27 }
  0x34   :  { %v931_v13 = vmul.f32 %v1790_v48, %v1790_v48 }
  0x35   :  { %v207_v56 = vadd.f32 %v206_v46, %v205_v28  ;;  %v925_v28 = vmul.f32 %v1765_v55, %v1765_v55  ;;  %v185_v36 = vrot.slane %v184_v7, 2  ;;  %v72_v46 = vld [vmem:[%s2839_s4] sm:$0xff]  ;;  %v970_v61 = vadd.f32 %v969_v34, %v923_v58 }
  0x36   :  { %v924_v58 = vmul.f32 %v1792_v50, %v1792_v50  ;;  %323 = vperm.xlu0 %1427, %v72_v46   ;;  %328 = vperm.xlu1 %1428, %v73_v60   ;;  %v933_v46 = vmul.f32 %v1807_v49, %v1807_v49 }
  0x37   :  { %v208_v24 = vrot.slane %v207_v56, 1  ;;  %v186_v0 = vadd.f32 %v185_v36, %v184_v7  ;;  %v948_v7 = vadd.f32 %v947_v42, %v920_v52  ;;  %v1818_v36 = vld [vmem:[#allocation2 + $0x1a8] sm:$0xff] }
  0x39   :  { %v209_v53 = vadd.f32 %v208_v24, %v207_v56  ;;  %v971_v56 = vadd.f32 %v970_v61, %v925_v28  ;;  %v187_v24 = vrot.slane %v186_v0, 1  ;;  %v102_v28 = vld [vmem:[%s2839_s4 + $0xf0] sm:$0xff]  ;;  %v949_v42 = vadd.f32 %v948_v7, %v922_v45 }
  0x3a   :  { %473 = vperm.xlu0 %1427, %v102_v28   ;;  %v935_v45 = vmul.f32 %v1818_v36, %v1818_v36  ;;  %v1843_v28 = vld [vmem:[#allocation2 + $0x190] sm:$0xff] }
  0x3b   :  { %v211_v63 = vmax.f32 %v209_v53, 1e-24  ;;  %v972_v22 = vadd.f32 %v971_v56, %v927_v40  ;;  %v188_v34 = vadd.f32 %v187_v24, %v186_v0  ;;  %v926_v53 = vmul.f32 %v1805_v9, %v1805_v9  ;;  %v1827_v0 = vld [vmem:[#allocation2 + $0x180] sm:$0xff]  ;;  %v1831_v56 = vld [vmem:[#allocation2 + $0x1b8] sm:$0xff] }
  0x3c   :  { %v928_v40 = vmul.f32 %v1813_v27, %v1813_v27  ;;  %v950_v61 = vadd.f32 %v949_v42, %v924_v58  ;;  %v930_v7 = vmul.f32 %v1827_v0, %v1827_v0  ;;  %v101_v58 = vld [vmem:[%s2839_s4 + $0xe8] sm:$0xff] }
  0x3d   :  { %1446 = vrsqrt.f32 %v211_v63  ;;  %v103_v63 = vld [vmem:[%s2839_s4 + $0xf8] sm:$0xff]  ;;  %v973_v52 = vadd.f32 %v972_v22, %v929_v5  ;;  %v210_v60 = vmax.f32 %v188_v34, 1e-24  ;;  %v100_v5 = vld [vmem:[%s2839_s4 + $0xe0] sm:$0xff] }
  0x3e   :  { %478 = vperm.xlu1 %1428, %v103_v63   ;;  %v951_v22 = vadd.f32 %v950_v61, %v926_v53  ;;  %463 = vperm.xlu0 %1427, %v100_v5   ;;  %v1847_v63 = vld [vmem:[#allocation2 + $0x1c8] sm:$0xff]  ;;  %v98_v53 = vld [vmem:[%s2839_s4 + $0xd0] sm:$0xff] }
  0x3f   :  { %v974_v24 = vadd.f32 %v973_v52, %v931_v13  ;;  %1448 = vrsqrt.f32 %v210_v60  ;;  %v937_v13 = vmul.f32 %v1831_v56, %v1831_v56  ;;  %v932_v60 = vmul.f32 %v1843_v28, %v1843_v28  ;;  %v1861_v5 = vld [vmem:[#allocation2 + $0x1e8] sm:$0xff] }
  0x40   :  { %v952_v42 = vadd.f32 %v951_v22, %v928_v40  ;;  %v1859_v40 = vld [vmem:[#allocation2 + $0x1d8] sm:$0xff] }
  0x41   :  { %v975_v34 = vadd.f32 %v974_v24, %v933_v46  ;;  %v99_v46 = vld [vmem:[%s2839_s4 + $0xd8] sm:$0xff]  ;;  %v1857_v24 = vld [vmem:[#allocation2 + $0x1a0] sm:$0xff] }
  0x42   :  { %468 = vperm.xlu1 %1428, %v101_v58   ;;  %v953_v61 = vadd.f32 %v952_v42, %v930_v7  ;;  %453 = vperm.xlu0 %1427, %v98_v53   ;;  %v1865_v58 = vld [vmem:[#allocation2 + $0x1b0] sm:$0xff]  ;;  %v96_v42 = vld [vmem:[%s2839_s4 + $0xc0] sm:$0xff]  ;;  %v934_v20 = vmul.f32 %v1857_v24, %v1857_v24  ;;  %v1885_v53 = vmul.f32 %v1859_v40, %v1859_v40 }
  0x43   :  { %v976_v52 = vadd.f32 %v975_v34, %v935_v45  ;;  %v939_v45 = vmul.f32 %v1847_v63, %v1847_v63  ;;  %v1867_v34 = vld [vmem:[#allocation2 + $0x1c0] sm:$0xff] }
  0x44   :  { %v954_v10 = vadd.f32 %v953_v61, %v932_v60 }
  0x45   :  { %v977_v22 = vadd.f32 %v976_v52, %v937_v13  ;;  %v97_v52 = vld [vmem:[%s2839_s4 + $0xc8] sm:$0xff] }
  0x46   :  { %458 = vperm.xlu1 %1428, %v99_v46   ;;  %v1889_v46 = vmul.f32 %v1861_v5, %v1861_v5  ;;  %443 = vperm.xlu0 %1427, %v96_v42  }
  0x47   :  { %v978_v61 = vadd.f32 %v977_v22, %v939_v45 }
  0x4a   :  { %v1869_v7 = vpop.eup %1446  ;;  %448 = vperm.xlu1 %1428, %v97_v52  }
  0x4b   :  { %v243_v50 = vmul.f32 %v1869_v7, %v1683_v21  ;;  %v245_v13 = vmul.f32 %v1869_v7, %v1687_v26  ;;  %v239_v60 = vmul.f32 %v1869_v7, %v1661_v59  ;;  %v936_v21 = vmul.f32 %v1865_v58, %v1865_v58 }
  0x4c   :  { %v1897_v26 = vmul.f32 %v1867_v34, %v1867_v34  ;;  %v241_v55 = vmul.f32 %v1869_v7, %v1665_v62  ;;  %v227_v39 = vmul.f32 %v1869_v7, %v1593_v16  ;;  %v229_v27 = vmul.f32 %v1869_v7, %v1609_v25  ;;  %v94_v62 = vld [vmem:[%s2839_s4 + $0xb0] sm:$0xff]  ;;  %v1914_v16 = vpop.eup %1448 }
  0x4d   :  { %v261_v35 = vpack.c.bf16 %v245_v13, %v243_v50  ;;  %v235_v59 = vmul.f32 %v1869_v7, %v1627_v38  ;;  %v223_v45 = vmul.f32 %v1869_v7, %v1581_v8  ;;  %v225_v22 = vmul.f32 %v1869_v7, %v1585_v11  ;;  %v95_v11 = vld [vmem:[%s2839_s4 + $0xb8] sm:$0xff]  ;;  %433 = vperm.xlu0 %1427, %v94_v62  }
  0x4e   :  { %v955_v50 = vadd.f32 %v954_v10, %v934_v20  ;;  %v1916_v25 = vpack.c.bf16 %v229_v27, %v227_v39  ;;  %v219_v38 = vmul.f32 %v1869_v7, %v1571_v3  ;;  %v221_v8 = vmul.f32 %v1869_v7, %v1573_v4  ;;  %438 = vperm.xlu1 %1428, %v95_v11   ;;  %v1954_v13 = vld [vmem:[#allocation2 + $0x1f8] sm:$0xff] }
  0x4f   :  { %278 = vmatprep.subr.bf16.mxu0 %v261_v35  ;;  %577 = vmatprep.subr.bf16.mxu1 %v261_v35  ;;  %v242_v42 = vmul.f32 %v1914_v16, %v1702_v41  ;;  %v244_v10 = vmul.f32 %v1914_v16, %v1716_v54  ;;  %v238_v20 = vmul.f32 %v1914_v16, %v1691_v29 }
  0x50   :  { %v240_v39 = vmul.f32 %v1914_v16, %v1693_v33  ;;  %v259_v3 = vpack.c.bf16 %v241_v55, %v239_v60  ;;  %v237_v4 = vmul.f32 %v1869_v7, %v1647_v51  ;;  %v231_v35 = vmul.f32 %v1869_v7, %v1617_v31  ;;  %v1965_v60 = vld [vmem:[#allocation2 + $0x1e0] sm:$0xff] }
  0x51   :  { %v233_v27 = vmul.f32 %v1869_v7, %v1619_v32  ;;  %v260_v41 = vpack.c.bf16 %v244_v10, %v242_v42  ;;  %v234_v54 = vmul.f32 %v1914_v16, %v1669_v6  ;;  %v226_v29 = vmul.f32 %v1914_v16, %v1625_v37  ;;  %v93_v6 = vld [vmem:[%s2839_s4 + $0xa8] sm:$0xff]  ;;  %v1956_v37 = vld [vmem:[#allocation2 + $0x1d0] sm:$0xff] }
  0x52   :  { %v228_v33 = vmul.f32 %v1914_v16, %v1633_v43  ;;  %v258_v55 = vpack.c.bf16 %v240_v39, %v238_v20  ;;  %v236_v51 = vmul.f32 %v1914_v16, %v1678_v19  ;;  %v1947_v31 = vpack.c.bf16 %v225_v22, %v223_v45  ;;  %428 = vperm.xlu1 %1428, %v93_v6  }
  0x53   :  { %v222_v32 = vmul.f32 %v1914_v16, %v1605_v23  ;;  %279 = vmatpush1.bf16.msra.mxu0 %v260_v41  ;;  %578 = vmatpush1.bf16.msra.mxu1 %v260_v41  ;;  %v224_v52 = vmul.f32 %v1914_v16, %v1615_v30  ;;  %v1960_v19 = vpack.c.bf16 %v221_v8, %v219_v38  ;;  %v92_v23 = vld [vmem:[%s2839_s4 + $0xa0] sm:$0xff] }
  0x54   :  { %v252_v43 = vpack.c.bf16 %v228_v33, %v226_v29  ;;  %280 = vmatprep.subr.bf16.mxu0 %v259_v3  ;;  %579 = vmatprep.subr.bf16.mxu1 %v259_v3  ;;  %v257_v45 = vpack.c.bf16 %v237_v4, %v235_v59  ;;  %v218_v22 = vmul.f32 %v1914_v16, %v1595_v17  ;;  %v91_v59 = vld [vmem:[%s2839_s4 + $0x98] sm:$0xff]  ;;  %v90_v3 = vld [vmem:[%s2839_s4 + $0x90] sm:$0xff] }
  0x55   :  { %v220_v62 = vmul.f32 %v1914_v16, %v1597_v18  ;;  %v250_v11 = vpack.c.bf16 %v224_v52, %v222_v32  ;;  %v945_v30 = vmul.f32 %v1954_v13, %v1954_v13  ;;  %v940_v38 = vmul.f32 %v1956_v37, %v1956_v37  ;;  %423 = vperm.xlu0 %1427, %v92_v23   ;;  %v1988_v4 = vld [vmem:[#allocation2 + $0x1f0] sm:$0xff] }
  0x56   :  { %v979_v42 = vadd.f32 %v978_v61, %v1885_v53  ;;  %v942_v17 = vmul.f32 %v1965_v60, %v1965_v60  ;;  %v956_v18 = vadd.f32 %v955_v50, %v936_v21  ;;  %v256_v10 = vpack.c.bf16 %v236_v51, %v234_v54  ;;  %418 = vperm.xlu1 %1428, %v91_v59  }
  0x57   :  { %v248_v8 = vpack.c.bf16 %v220_v62, %v218_v22  ;;  %281 = vmatpush1.bf16.msra.mxu0 %v258_v55  ;;  %580 = vmatpush1.bf16.msra.mxu1 %v258_v55  ;;  %v230_v20 = vmul.f32 %v1914_v16, %v1635_v44  ;;  %v232_v39 = vmul.f32 %v1914_v16, %v1656_v57 }
  0x58   :  { %282 = vmatprep.subr.bf16.mxu0 %v257_v45  ;;  %581 = vmatprep.subr.bf16.mxu1 %v257_v45  ;;  %v255_v53 = vpack.c.bf16 %v233_v27, %v231_v35  ;;  %v980_v61 = vadd.f32 %v979_v42, %v1889_v46  ;;  %v957_v21 = vadd.f32 %v956_v18, %v1897_v26 }
  0x59   :  { %413 = vperm.xlu0 %1427, %v90_v3   ;;  %v944_v44 = vmul.f32 %v1988_v4, %v1988_v4  ;;  %v254_v41 = vpack.c.bf16 %v232_v39, %v230_v20  ;;  %v215_v51 = vmul.f32 %v1869_v7, %v1567_v1  ;;  %v217_v32 = vmul.f32 %v1869_v7, %v1569_v2 }
  0x5a   :  { %v981_v50 = vadd.f32 %v980_v61, %v945_v30  ;;  %v958_v57 = vadd.f32 %v957_v21, %v940_v38  ;;  %v214_v45 = vmul.f32 %v1914_v16, %v1589_v14  ;;  %v2011_v14 = vld [vmem:[%s2836_s1] sm:$0xff]   ;;  %v2097_v21 = vld [vmem:[%s2838_s3 + $0x18] sm:$0xff]  }
  0x5b   :  { %283 = vmatpush1.bf16.msra.mxu0 %v256_v10  ;;  %582 = vmatpush1.bf16.msra.mxu1 %v256_v10  ;;  %v247_v1 = vpack.c.bf16 %v217_v32, %v215_v51  ;;  %2946 = vst [vmem:[#allocation31_spill] sm:$0xff] %v2097_v21  ;;  %v2957_v51 = vld [vmem:[#allocation11_spill] sm:$0xff] }
  0x5c   :  { %284 = vmatprep.subr.bf16.mxu0 %v255_v53  ;;  %583 = vmatprep.subr.bf16.mxu1 %v255_v53  ;;  %v982_v54 = vrot.slane %v981_v50, 4  ;;  %v959_v29 = vadd.f32 %v958_v57, %v942_v17 }
  0x5e   :  { %v983_v33 = vadd.f32 %v982_v54, %v981_v50  ;;  %v960_v35 = vadd.f32 %v959_v29, %v944_v44  ;;  %v2948_v50 = vld [vmem:[#allocation20_spill] sm:$0xff]  ;;  %v2953_v29 = vld [vmem:[#allocation18_spill] sm:$0xff] }
  0x5f   :  { %285 = vmatpush1.bf16.msra.mxu0 %v254_v41  ;;  %584 = vmatpush1.bf16.msra.mxu1 %v254_v41  ;;  %v2951_v41 = vld [vmem:[#allocation16_spill] sm:$0xff] }
  0x60   :  { %286 = vmatprep.subr.bf16.mxu0 %v1916_v25  ;;  %585 = vmatprep.subr.bf16.mxu1 %v1916_v25  ;;  %v984_v46 = vrot.slane %v983_v33, 2  ;;  %v961_v26 = vrot.slane %v960_v35, 4 }
  0x62   :  { %v985_v27 = vadd.f32 %v984_v46, %v983_v33  ;;  %v962_v55 = vadd.f32 %v961_v26, %v960_v35  ;;  %v2954_v35 = vld [vmem:[#allocation19_spill] sm:$0xff] }
  0x63   :  { %287 = vmatpush1.bf16.msra.mxu0 %v252_v43  ;;  %586 = vmatpush1.bf16.msra.mxu1 %v252_v43  ;;  %v216_v43 = vmul.f32 %v1914_v16, %v1591_v15  ;;  %v2016_v15 = vld [vmem:[%s2838_s3] sm:$0xff]   ;;  %v2936_v16 = vmov 0  }
  0x64   :  { %288 = vmatprep.subr.bf16.mxu0 %v1947_v31  ;;  %587 = vmatprep.subr.bf16.mxu1 %v1947_v31  ;;  %v986_v6 = vrot.slane %v985_v27, 1  ;;  %v963_v52 = vrot.slane %v962_v55, 2  ;;  %2935 = vst [vmem:[#allocation21_spill] sm:$0xff] %v2016_v15 }
  0x65   :  { %v246_v7 = vpack.c.bf16 %v216_v43, %v214_v45  ;;  %v2961_v45 = vld [vmem:[#allocation17_spill] sm:$0xff] }
  0x66   :  { %v987_v23 = vadd.f32 %v986_v6, %v985_v27  ;;  %v964_v25 = vadd.f32 %v963_v52, %v962_v55  ;;  %v2956_v27 = vld [vmem:[#allocation10_spill] sm:$0xff]  ;;  %v2132_v6 = vld [vmem:[%s2838_s3 + $0x20] sm:$0xff]  }
  0x67   :  { %289 = vmatpush1.bf16.msra.mxu0 %v250_v11  ;;  %588 = vmatpush1.bf16.msra.mxu1 %v250_v11  ;;  %2958 = vst [vmem:[#allocation18_spill] sm:$0xff] %v2132_v6 }
  0x68   :  { %290 = vmatprep.subr.bf16.mxu0 %v1960_v19  ;;  %589 = vmatprep.subr.bf16.mxu1 %v1960_v19  ;;  %v989_v31 = vmax.f32 %v987_v23, 1e-24  ;;  %v965_v22 = vrot.slane %v964_v25, 1  ;;  %v2024_v19 = vld [vmem:[%s2838_s3 + $0x8] sm:$0xff]   ;;  %v2960_v23 = vld [vmem:[#allocation15_spill] sm:$0xff] }
  0x69   :  { %2937 = vst [vmem:[#allocation22_spill] sm:$0xff] %v2024_v19 }
  0x6a   :  { %1450 = vrsqrt.f32 %v989_v31  ;;  %v966_v2 = vadd.f32 %v965_v22, %v964_v25  ;;  %v2963_v31 = vld [vmem:[#allocation8_spill] sm:$0xff] }
  0x6b   :  { %291 = vmatpush1.bf16.msra.mxu0 %v248_v8  ;;  %590 = vmatpush1.bf16.msra.mxu1 %v248_v8 }
  0x6c   :  { %292 = vmatprep.subr.bf16.mxu0 %v247_v1  ;;  %591 = vmatprep.subr.bf16.mxu1 %v247_v1  ;;  %v988_v62 = vmax.f32 %v966_v2, 1e-24  ;;  %v2964_v2 = vld [vmem:[#allocation9_spill] sm:$0xff] }
  0x6e   :  { %1452 = vrsqrt.f32 %v988_v62 }
  0x6f   :  { %293 = vmatpush1.bf16.msra.mxu0 %v246_v7  ;;  %592 = vmatpush1.bf16.msra.mxu1 %v246_v7 }
  0x72   :  { %311 = vmatmul.mubr.bf16.vlgmr.msra.gmra.mxu0 %v2011_v14  ;;  %610 = vmatmul.mubr.bf16.vlgmr.msra.gmra.mxu1 %v2016_v15 }
  0x73   :  { %619 = vmatprep.mubr.bf16.mxu1 %v2936_v16 }
  0x77   :  { %v2026_v11 = vpop.eup %1450 }
  0x78   :  { %v1021_v30 = vmul.f32 %v2026_v11, %v1861_v5  ;;  %v1023_v38 = vmul.f32 %v2026_v11, %v1954_v13  ;;  %v1017_v8 = vmul.f32 %v2026_v11, %v1847_v63  ;;  %v1019_v59 = vmul.f32 %v2026_v11, %v1859_v40 }
  0x79   :  { %v1013_v10 = vmul.f32 %v2026_v11, %v1818_v36  ;;  %v1015_v20 = vmul.f32 %v2026_v11, %v1831_v56  ;;  %v1009_v3 = vmul.f32 %v2026_v11, %v1790_v48  ;;  %v1007_v61 = vmul.f32 %v2026_v11, %v1788_v47  ;;  %v2950_v47 = vld [vmem:[#allocation12_spill] sm:$0xff] }
  0x7a   :  { %620 = vmatmul.mubr.bf16.gmra.mxu1 %v2024_v19  ;;  %v2037_v42 = vpack.c.bf16 %v1023_v38, %v1021_v30  ;;  %v2051_v18 = vpack.c.bf16 %v1019_v59, %v1017_v8  ;;  %v1001_v57 = vmul.f32 %v2026_v11, %v2950_v47  ;;  %v1003_v54 = vmul.f32 %v2026_v11, %v2951_v41  ;;  %v2966_v30 = vld [vmem:[#allocation13_spill] sm:$0xff]  ;;  %v2967_v8 = vld [vmem:[#allocation14_spill] sm:$0xff] }
  0x7b   :  { %v2039_v17 = vpop.eup %1452  ;;  %629 = vmatprep.mubr.bf16.mxu1 %v2936_v16  ;;  %v2072_v56 = vpack.c.bf16 %v1015_v20, %v1013_v10  ;;  %v997_v55 = vmul.f32 %v2026_v11, %v2956_v27  ;;  %v999_v32 = vmul.f32 %v2026_v11, %v2957_v51  ;;  %v993_v22 = vmul.f32 %v2026_v11, %v2963_v31  ;;  %v2196_v10 = vld [vmem:[%s2838_s3 + $0x48] sm:$0xff]   ;;  %v2203_v20 = vld [vmem:[%s2838_s3 + $0x50] sm:$0xff]  }
  0x7c   :  { %2938 = vst [vmem:[#allocation23_spill] sm:$0xff] %v2037_v42  ;;  %1040 = vmatprep.subr.bf16.mxu1 %v2037_v42  ;;  %v1020_v5 = vmul.f32 %v2039_v17, %v1965_v60  ;;  %v1022_v13 = vmul.f32 %v2039_v17, %v1988_v4  ;;  %v1016_v63 = vmul.f32 %v2039_v17, %v1867_v34  ;;  %2939 = vst [vmem:[#allocation24_spill] sm:$0xff] %v2051_v18  ;;  %v2060_v60 = vld [vmem:[%s2838_s3 + $0x10] sm:$0xff]  }
  0x7d   :  { %v1018_v40 = vmul.f32 %v2039_v17, %v1956_v37  ;;  %2940 = vst [vmem:[#allocation25_spill] sm:$0xff] %v2060_v60  ;;  %v1012_v37 = vmul.f32 %v2039_v17, %v1857_v24  ;;  %v1014_v36 = vmul.f32 %v2039_v17, %v1865_v58  ;;  %2943 = vst [vmem:[#allocation28_spill] sm:$0xff] %v2072_v56 }
  0x7e   :  { %v2062_v39 = vpack.c.bf16 %v1022_v13, %v1020_v5  ;;  %v1011_v4 = vmul.f32 %v2026_v11, %v1807_v49  ;;  %v1008_v58 = vmul.f32 %v2039_v17, %v1827_v0  ;;  %v1010_v53 = vmul.f32 %v2039_v17, %v1843_v28  ;;  %2974 = vst [vmem:[#allocation33_spill] sm:$0xff] %v2196_v10 }
  0x7f   :  { %v2065_v34 = vpack.c.bf16 %v1018_v40, %v1016_v63  ;;  %v2081_v24 = vpack.c.bf16 %v1014_v36, %v1012_v37  ;;  %v1005_v49 = vmul.f32 %v2026_v11, %v1774_v12  ;;  %v1004_v28 = vmul.f32 %v2039_v17, %v1805_v9  ;;  %v2182_v63 = vld [vmem:[%s2838_s3 + $0x38] sm:$0xff]   ;;  %v2189_v40 = vld [vmem:[%s2838_s3 + $0x40] sm:$0xff]   ;;  %2975 = vst [vmem:[#allocation34_spill] sm:$0xff] %v2203_v20 }
  0x80   :  { %2941 = vst [vmem:[#allocation26_spill] sm:$0xff] %v2062_v39  ;;  %1041 = vmatpush1.bf16.msra.mxu1 %v2062_v39  ;;  %v2088_v48 = vpack.c.bf16 %v1011_v4, %v1009_v3  ;;  %v2100_v0 = vpack.c.bf16 %v1010_v53, %v1008_v58  ;;  %v1006_v44 = vmul.f32 %v2039_v17, %v2948_v50  ;;  %2972 = vst [vmem:[#allocation13_spill] sm:$0xff] %v2182_v63  ;;  %v2210_v37 = vld [vmem:[%s2838_s3 + $0x58] sm:$0xff]   ;;  %v2217_v36 = vld [vmem:[%s2838_s3 + $0x60] sm:$0xff]  }
  0x81   :  { %2942 = vst [vmem:[#allocation27_spill] sm:$0xff] %v2065_v34  ;;  %1042 = vmatprep.subr.bf16.mxu1 %v2051_v18  ;;  %2944 = vst [vmem:[#allocation29_spill] sm:$0xff] %v2081_v24  ;;  %v2107_v12 = vpack.c.bf16 %v1007_v61, %v1005_v49  ;;  %v1000_v33 = vmul.f32 %v2039_v17, %v2953_v29  ;;  %v1002_v46 = vmul.f32 %v2039_v17, %v2954_v35  ;;  %v2224_v3 = vld [vmem:[%s2838_s3 + $0x68] sm:$0xff]   ;;  %v2231_v4 = vld [vmem:[%s2838_s3 + $0x70] sm:$0xff]  }
  0x82   :  { %630 = vmatmul.mubr.bf16.gmra.mxu1 %v2060_v60  ;;  %2945 = vst [vmem:[#allocation30_spill] sm:$0xff] %v2088_v48  ;;  %2947 = vst [vmem:[#allocation32_spill] sm:$0xff] %v2100_v0  ;;  %v2116_v9 = vpack.c.bf16 %v1006_v44, %v1004_v28  ;;  %v2123_v26 = vpack.c.bf16 %v1003_v54, %v1001_v57  ;;  %v996_v25 = vmul.f32 %v2039_v17, %v2960_v23  ;;  %v2238_v58 = vld [vmem:[%s2838_s3 + $0x78] sm:$0xff]  }
  0x83   :  { %639 = vmatprep.mubr.bf16.mxu1 %v2936_v16  ;;  %2949 = vst [vmem:[#allocation20_spill] sm:$0xff] %v2107_v12  ;;  %v2135_v52 = vpack.c.bf16 %v1002_v46, %v1000_v33  ;;  %v998_v43 = vmul.f32 %v2039_v17, %v2961_v45  ;;  %v2142_v1 = vpack.c.bf16 %v999_v32, %v997_v55  ;;  %2973 = vst [vmem:[#allocation14_spill] sm:$0xff] %v2189_v40 }
  0x84   :  { %1043 = vmatpush1.bf16.msra.mxu1 %v2065_v34  ;;  %2952 = vst [vmem:[#allocation12_spill] sm:$0xff] %v2116_v9  ;;  %2955 = vst [vmem:[#allocation16_spill] sm:$0xff] %v2123_v26  ;;  %v995_v7 = vmul.f32 %v2026_v11, %v2964_v2  ;;  %v992_v38 = vmul.f32 %v2039_v17, %v2966_v30  ;;  %v994_v59 = vmul.f32 %v2039_v17, %v2967_v8  ;;  %v2163_v11 = vld [vmem:[%s2838_s3 + $0x28] sm:$0xff]   ;;  %v2175_v17 = vld [vmem:[%s2838_s3 + $0x30] sm:$0xff]  }
  0x85   :  { %1044 = vmatprep.subr.bf16.mxu1 %v2072_v56  ;;  %2959 = vst [vmem:[#allocation19_spill] sm:$0xff] %v2135_v52  ;;  %2962 = vst [vmem:[#allocation10_spill] sm:$0xff] %v2142_v1  ;;  %v2151_v62 = vpack.c.bf16 %v998_v43, %v996_v25 }
  0x86   :  { %v2158_v5 = vpack.c.bf16 %v995_v7, %v993_v22  ;;  %2969 = vst [vmem:[#allocation17_spill] sm:$0xff] %v2163_v11  ;;  %v2166_v13 = vpack.c.bf16 %v994_v59, %v992_v38  ;;  %2971 = vst [vmem:[#allocation9_spill] sm:$0xff] %v2175_v17 }
  0x87   :  { %2965 = vst [vmem:[#allocation11_spill] sm:$0xff] %v2151_v62  ;;  %2976 = vst [vmem:[#allocation35_spill] sm:$0xff] %v2210_v37 }
  0x88   :  { %1045 = vmatpush1.bf16.msra.mxu1 %v2081_v24  ;;  %2968 = vst [vmem:[#allocation15_spill] sm:$0xff] %v2158_v5  ;;  %2970 = vst [vmem:[#allocation8_spill] sm:$0xff] %v2166_v13 }
  0x89   :  { %1046 = vmatprep.subr.bf16.mxu1 %v2088_v48  ;;  %2977 = vst [vmem:[#allocation36_spill] sm:$0xff] %v2217_v36  ;;  %2978 = vst [vmem:[#allocation37_spill] sm:$0xff] %v2224_v3 }
  0x8a   :  { %640 = vmatmul.mubr.bf16.gmra.mxu1 %v2097_v21  ;;  %2979 = vst [vmem:[#allocation38_spill] sm:$0xff] %v2231_v4  ;;  %2980 = vst [vmem:[#allocation39_spill] sm:$0xff] %v2238_v58 }
  0x8b   :  { %649 = vmatprep.mubr.bf16.mxu1 %v2936_v16 }
  0x8c   :  { %1047 = vmatpush1.bf16.msra.mxu1 %v2100_v0 }
  0x8d   :  { %1048 = vmatprep.subr.bf16.mxu1 %v2107_v12 }
  0x90   :  { %1049 = vmatpush1.bf16.msra.mxu1 %v2116_v9 }
  0x91   :  { %1050 = vmatprep.subr.bf16.mxu1 %v2123_v26  ;;  %v2243_v53 = vpop.permute.xlu0 %393  ;;  %v2245_v49 = vpop.permute.xlu1 %383 }
  0x92   :  { %650 = vmatmul.mubr.bf16.gmra.mxu1 %v2132_v6  ;;  %2981 = vst [vmem:[#allocation40_spill] sm:$0xff] %v2243_v53 }
  0x93   :  { %659 = vmatprep.mubr.bf16.mxu1 %v2936_v16 }
  0x94   :  { %1051 = vmatpush1.bf16.msra.mxu1 %v2135_v52 }
  0x95   :  { %1052 = vmatprep.subr.bf16.mxu1 %v2142_v1  ;;  %v2247_v61 = vpop.permute.xlu0 %398  ;;  %v2249_v28 = vpop.permute.xlu1 %388 }
  0x98   :  { %1053 = vmatpush1.bf16.msra.mxu1 %v2151_v62 }
  0x99   :  { %1054 = vmatprep.subr.bf16.mxu1 %v2158_v5  ;;  %v2251_v50 = vpop.permute.xlu1 %378  ;;  %v2253_v44 = vpop.permute.xlu0 %373 }
  0x9a   :  { %660 = vmatmul.mubr.bf16.gmra.mxu1 %v2163_v11 }
  0x9b   :  { %669 = vmatprep.mubr.bf16.mxu1 %v2936_v16 }
  0x9c   :  { %1055 = vmatpush1.bf16.msra.mxu1 %v2166_v13 }
  0x9d   :  { %v2255_v47 = vpop.permute.xlu1 %368  ;;  %v2257_v57 = vpop.permute.xlu0 %363 }
  0x9e   :  { %2982 = vst [vmem:[#allocation41_spill] sm:$0xff] %v2255_v47  ;;  %2983 = vst [vmem:[#allocation42_spill] sm:$0xff] %v2257_v57 }
  0xa1   :  { %v2259_v41 = vpop.permute.xlu1 %358  ;;  %v2261_v54 = vpop.permute.xlu0 %353 }
  0xa2   :  { %670 = vmatmul.mubr.bf16.gmra.mxu1 %v2175_v17 }
  0xa3   :  { %679 = vmatprep.mubr.bf16.mxu1 %v2936_v16 }
  0xa5   :  { %v2265_v29 = vpop.permute.xlu0 %264 }
  0xa9   :  { %v2269_v35 = vpop.permute.xlu0 %343 }
  0xaa   :  { %680 = vmatmul.mubr.bf16.gmra.mxu1 %v2182_v63  ;;  %2985 = vst [vmem:[#allocation44_spill] sm:$0xff] %v2269_v35 }
  0xab   :  { %689 = vmatprep.mubr.bf16.mxu1 %v2936_v16 }
  0xad   :  { %v2273_v27 = vpop.permute.xlu0 %333 }
  0xae   :  { %2987 = vst [vmem:[#allocation46_spill] sm:$0xff] %v2273_v27 }
  0xb1   :  { %v2280_v43 = vpop.permute.xlu0 %323 }
  0xb2   :  { %690 = vmatmul.mubr.bf16.gmra.mxu1 %v2189_v40  ;;  %2990 = vst [vmem:[#allocation49_spill] sm:$0xff] %v2280_v43 }
  0xb3   :  { %699 = vmatprep.mubr.bf16.mxu1 %v2936_v16 }
  0xba   :  { %700 = vmatmul.mubr.bf16.gmra.mxu1 %v2196_v10 }
  0xbb   :  { %709 = vmatprep.mubr.bf16.mxu1 %v2936_v16 }
  0xc2   :  { %710 = vmatmul.mubr.bf16.gmra.mxu1 %v2203_v20 }
  0xc3   :  { %719 = vmatprep.mubr.bf16.mxu1 %v2936_v16 }
  0xca   :  { %720 = vmatmul.mubr.bf16.gmra.mxu1 %v2210_v37 }
  0xcb   :  { %729 = vmatprep.mubr.bf16.mxu1 %v2936_v16 }
  0xd2   :  { %730 = vmatmul.mubr.bf16.gmra.mxu1 %v2217_v36 }
  0xd3   :  { %739 = vmatprep.mubr.bf16.mxu1 %v2936_v16 }
  0xda   :  { %740 = vmatmul.mubr.bf16.gmra.mxu1 %v2224_v3 }
  0xdb   :  { %749 = vmatprep.mubr.bf16.mxu1 %v2936_v16 }
  0xe2   :  { %750 = vmatmul.mubr.bf16.gmra.mxu1 %v2231_v4 }
  0xe3   :  { %759 = vmatprep.mubr.bf16.mxu1 %v2936_v16 }
  0xea   :  { %760 = vmatmul.mubr.bf16.gmra.mxu1 %v2238_v58 }
  0xeb   :  { %1072 = vmatprep.mubr.bf16.mxu1 %v2936_v16 }
  0xf2   :  { %1073 = vmatmul.mubr.bf16.vlgmr.msra.gmra.mxu1 %v2011_v14  ;;  %v2263_v14 = vpop.permute.xlu1 %269 }
  0xf6   :  { %v2267_v33 = vpop.permute.xlu1 %348 }
  0xf7   :  { %2984 = vst [vmem:[#allocation43_spill] sm:$0xff] %v2267_v33 }
  0xfa   :  { %v2271_v46 = vpop.permute.xlu1 %338 }
  0xfb   :  { %2986 = vst [vmem:[#allocation45_spill] sm:$0xff] %v2271_v46 }
  0xfe   :  { %v2278_v45 = vpop.permute.xlu1 %328 }
  0xff   :  { %2989 = vst [vmem:[#allocation48_spill] sm:$0xff] %v2278_v45 }
 0x132   :  { %v611_v55 = vpop.f32.mrf.mxu1  ;;  %v312_v51 = vpop.f32.mrf.mxu0 }
 0x133   :  { %v2276_v32 = vadd.f32 %v312_v51, %v2265_v29  ;;  %v2286_v7 = vadd.f32 %v611_v55, %v2280_v43 }
 0x134   :  { %v314_v23 = vpop.f32.mrf.mxu0  ;;  %v613_v25 = vpop.f32.mrf.mxu1 }
 0x135   :  { %2988 = vst [vmem:[#allocation47_spill] sm:$0xff] %v2276_v32  ;;  %v2283_v31 = vadd.f32 %v314_v23, %v2265_v29  ;;  %v2297_v58 = vadd.f32 %v613_v25, %v2280_v43 }
 0x136   :  { %v615_v22 = vpop.f32.mrf.mxu1  ;;  %v316_v2 = vpop.f32.mrf.mxu0 }
 0x137   :  { %2991 = vst [vmem:[#allocation50_spill] sm:$0xff] %v2283_v31  ;;  %v2289_v30 = vadd.f32 %v615_v22, %v2278_v45  ;;  %v2292_v38 = vadd.f32 %v316_v2, %v2263_v14  ;;  %v802_v8 = vmax.f32 %v2276_v32, %v2283_v31 }
 0x138   :  { %v318_v59 = vpop.f32.mrf.mxu0  ;;  %v617_v51 = vpop.f32.mrf.mxu1 }
 0x139   :  { %2992 = vst [vmem:[#allocation51_spill] sm:$0xff] %v2292_v38  ;;  %v2302_v55 = vadd.f32 %v318_v59, %v2263_v14  ;;  %v2305_v22 = vadd.f32 %v617_v51, %v2278_v45  ;;  %803 = vmax.xlane.f32.xlu0 %v802_v8 }
 0x13a   :  { %v621_v2 = vpop.f32.mrf.mxu1 }
 0x13b   :  { %2993 = vst [vmem:[#allocation52_spill] sm:$0xff] %v2302_v55  ;;  %v805_v3 = vmax.f32 %v2292_v38, %v2302_v55  ;;  %v2312_v43 = vadd.f32 %v621_v2, %v2273_v27 }
 0x13c   :  { %v623_v36 = vpop.f32.mrf.mxu1 }
 0x13d   :  { %806 = vmax.xlane.f32.xlu1 %v805_v3  ;;  %v2318_v51 = vadd.f32 %v623_v36, %v2273_v27 }
 0x13e   :  { %v625_v25 = vpop.f32.mrf.mxu1 }
 0x13f   :  { %v2315_v59 = vadd.f32 %v625_v25, %v2271_v46 }
 0x140   :  { %v627_v23 = vpop.f32.mrf.mxu1 }
 0x141   :  { %v2323_v4 = vadd.f32 %v627_v23, %v2271_v46 }
 0x142   :  { %v631_v45 = vpop.f32.mrf.mxu1 }
 0x143   :  { %v2328_v20 = vadd.f32 %v631_v45, %v2269_v35  ;;  %v89_v45 = vld [vmem:[%s2839_s4 + $0x88] sm:$0xff] }
 0x144   :  { %v633_v37 = vpop.f32.mrf.mxu1 }
 0x145   :  { %v2334_v27 = vadd.f32 %v633_v37, %v2269_v35  ;;  %v88_v37 = vld [vmem:[%s2839_s4 + $0x80] sm:$0xff]  ;;  %s1526_s4 = smov [#allocation5]  }
 0x146   :  { %v635_v2 = vpop.f32.mrf.mxu1  ;;  %s1393_s0 = sshll.u32 %s1526_s4, 4  ;;  %s1394_s0 = int_to_ptr.vmem [resolvable:$true] %s1393_s0 }
 0x147   :  { %v2331_v25 = vadd.f32 %v635_v2, %v2267_v33  ;;  %s1498_s25 = scalar_lea.vmem %s1394_s0, 1024  ;;  %p1503_p6 = scmp.lt.s32.totalorder %s1394_s0, %s1394_s0 }
 0x148   :  { %v637_v36 = vpop.f32.mrf.mxu1  ;;  %p1499_p5 = scmp.ne.s32.totalorder %s1394_s0, %s1498_s25  ;;  %p1504_p7 = scmp.lt.s32.totalorder %s1498_s25, %s1498_s25 }
 0x149   :  { %v2339_v8 = vadd.f32 %v637_v36, %v2267_v33 }
 0x14a   :  { %v641_v46 = vpop.f32.mrf.mxu1  ;;  %p1505_p8 = por %p1504_p7, %p1503_p6 }
 0x14b   :  { %v2352_v23 = vadd.f32 %v641_v46, %v2261_v54  ;;  %v2369_v46 = vpop.permute.xlu0 %473 }
 0x14c   :  { %v2346_v2 = vpop.f32.mrf.mxu1  ;;  %p1506_p9 = pnand %p1505_p8, %p1499_p5 }
 0x14e   :  { %v645_v35 = vpop.f32.mrf.mxu1  ;;  %408 = vperm.xlu1 %1428, %v89_v45   ;;  %v2367_v45 = vpop.permute.xlu1 %478 }
 0x14f   :  { %v2355_v36 = vadd.f32 %v645_v35, %v2259_v41  ;;  %403 = vperm.xlu0 %1427, %v88_v37   ;;  %v2373_v21 = vpop.permute.xlu0 %463 }
 0x150   :  { %v2357_v3 = vpop.f32.mrf.mxu1 }
 0x152   :  { %v2361_v10 = vpop.f32.mrf.mxu1  ;;  %v2371_v37 = vpop.permute.xlu1 %468 }
 0x153   :  { %v2377_v13 = vpop.permute.xlu0 %453 }
 0x154   :  { %v2363_v40 = vpop.f32.mrf.mxu1 }
 0x156   :  { %v2365_v63 = vpop.f32.mrf.mxu1  ;;  %v2375_v15 = vpop.permute.xlu1 %458 }
 0x157   :  { %v2381_v26 = vpop.permute.xlu0 %443 }
 0x158   :  { %v657_v17 = vpop.f32.mrf.mxu1  ;;  %2994 = vst [vmem:[#allocation53_spill] sm:$0xff] %v2381_v26 }
 0x15a   :  { %v661_v11 = vpop.f32.mrf.mxu1  ;;  %v2379_v52 = vpop.permute.xlu1 %448 }
 0x15b   :  { %v2389_v16 = vpop.permute.xlu0 %433 }
 0x15c   :  { %v663_v35 = vpop.f32.mrf.mxu1 }
 0x15e   :  { %v665_v6 = vpop.f32.mrf.mxu1  ;;  %v2384_v24 = vpop.permute.xlu1 %438 }
 0x160   :  { %v667_v60 = vpop.f32.mrf.mxu1 }
 0x162   :  { %v671_v33 = vpop.f32.mrf.mxu1 }
 0x164   :  { %v673_v19 = vpop.f32.mrf.mxu1 }
 0x165   :  { %v674_v55 = vadd.f32 %v673_v19, %v2245_v49  ;;  %v668_v19 = vadd.f32 %v667_v60, %v2251_v50  ;;  %v666_v60 = vadd.f32 %v665_v6, %v2251_v50 }
 0x166   :  { %v675_v5 = vpop.f32.mrf.mxu1 }
 0x168   :  { %v677_v62 = vpop.f32.mrf.mxu1 }
 0x169   :  { %v678_v56 = vadd.f32 %v677_v62, %v2249_v28 }
 0x16a   :  { %v681_v1 = vpop.f32.mrf.mxu1 }
 0x16b   :  { %v682_v39 = vadd.f32 %v681_v1, %v2243_v53  ;;  %v783_v32 = vpack.c.bf16 %v678_v56, %v674_v55  ;;  %v676_v1 = vadd.f32 %v675_v5, %v2249_v28 }
 0x16c   :  { %v683_v9 = vpop.f32.mrf.mxu1 }
 0x16d   :  { %v684_v34 = vadd.f32 %v683_v9, %v2243_v53  ;;  %v2399_v9 = vpop.permute.xlu1 %428 }
 0x16e   :  { %v685_v12 = vpop.f32.mrf.mxu1  ;;  %2995 = vst [vmem:[#allocation54_spill] sm:$0xff] %v2399_v9 }
 0x16f   :  { %v686_v0 = vadd.f32 %v685_v12, %v2247_v61 }
 0x170   :  { %v687_v48 = vpop.f32.mrf.mxu1 }
 0x171   :  { %v688_v18 = vadd.f32 %v687_v48, %v2247_v61  ;;  %v784_v31 = vpack.c.bf16 %v686_v0, %v682_v39  ;;  %v2401_v48 = vpop.permute.xlu0 %423 }
 0x172   :  { %v2392_v42 = vpop.f32.mrf.mxu1  ;;  %2996 = vst [vmem:[#allocation55_spill] sm:$0xff] %v2401_v48 }
 0x173   :  { %v785_v38 = vpack.c.bf16 %v688_v18, %v684_v34  ;;  %v672_v18 = vadd.f32 %v671_v33, %v2245_v49  ;;  %v664_v34 = vadd.f32 %v663_v35, %v2253_v44  ;;  %v658_v35 = vadd.f32 %v657_v17, %v2255_v47 }
 0x174   :  { %v2395_v12 = vpop.f32.mrf.mxu1 }
 0x175   :  { %830 = vmatprep.subr.bf16.mxu0 %v785_v38  ;;  %v782_v56 = vpack.c.bf16 %v676_v1, %v672_v18  ;;  %v2409_v38 = vpop.permute.xlu1 %418  ;;  %v2411_v55 = vpop.permute.xlu0 %413 }
 0x176   :  { %v2397_v26 = vpop.f32.mrf.mxu1  ;;  %831 = vmatpush1.bf16.xpose.msra.mxu0 %v784_v31  ;;  %2997 = vst [vmem:[#allocation56_spill] sm:$0xff] %v2409_v38  ;;  %v781_v31 = vpack.c.bf16 %v668_v19, %v664_v34  ;;  %2998 = vst [vmem:[#allocation57_spill] sm:$0xff] %v2411_v55 }
 0x177   :  { %832 = vmatprep.subr.bf16.mxu0 %v783_v32 }
 0x178   :  { %v2404_v62 = vpop.f32.mrf.mxu1 }
 0x17a   :  { %v701_v39 = vpop.f32.mrf.mxu1 }
 0x17b   :  { %v2414_v5 = vadd.f32 %v701_v39, %v2411_v55  ;;  %v662_v39 = vadd.f32 %v661_v11, %v2253_v44  ;;  %v656_v11 = vadd.f32 %v2365_v63, %v2255_v47  ;;  %v644_v63 = vadd.f32 %v2346_v2, %v2261_v54 }
 0x17c   :  { %v703_v0 = vpop.f32.mrf.mxu1  ;;  %v3002_v2 = vpack.c.bf16 %v2323_v4, %v2318_v51  ;;  %v3005_v4 = vpack.c.bf16 %v2289_v30, %v2286_v7 }
 0x17d   :  { %v2422_v1 = vadd.f32 %v703_v0, %v2411_v55 }
 0x17e   :  { %v705_v32 = vpop.f32.mrf.mxu1  ;;  %833 = vmatpush1.bf16.xpose.msra.mxu0 %v782_v56  ;;  %v654_v56 = vadd.f32 %v2363_v40, %v2257_v57  ;;  %v648_v40 = vadd.f32 %v2357_v3, %v2259_v41 }
 0x17f   :  { %v2417_v53 = vadd.f32 %v705_v32, %v2409_v38  ;;  %834 = vmatprep.subr.bf16.mxu0 %v781_v31  ;;  %v780_v31 = vpack.c.bf16 %v666_v60, %v662_v39 }
 0x180   :  { %v707_v33 = vpop.f32.mrf.mxu1  ;;  %v779_v32 = vpack.c.bf16 %v658_v35, %v654_v56 }
 0x181   :  { %v2427_v18 = vadd.f32 %v707_v33, %v2409_v38 }
 0x182   :  { %v711_v34 = vpop.f32.mrf.mxu1 }
 0x183   :  { %v2435_v55 = vadd.f32 %v711_v34, %v2401_v48  ;;  %v652_v34 = vadd.f32 %v2361_v10, %v2257_v57 }
 0x184   :  { %v713_v17 = vpop.f32.mrf.mxu1 }
 0x185   :  { %v2445_v60 = vadd.f32 %v713_v17, %v2401_v48  ;;  %v778_v3 = vpack.c.bf16 %v656_v11, %v652_v34  ;;  %v777_v17 = vpack.c.bf16 %v648_v40, %v644_v63  ;;  %v2999_v40 = vpack.c.bf16 %v2355_v36, %v2352_v23 }
 0x186   :  { %v715_v0 = vpop.f32.mrf.mxu1  ;;  %835 = vmatpush1.bf16.xpose.msra.mxu0 %v780_v31  ;;  %v3001_v31 = vpack.c.bf16 %v2331_v25, %v2328_v20 }
 0x187   :  { %v2438_v33 = vadd.f32 %v715_v0, %v2399_v9  ;;  %836 = vmatprep.subr.bf16.mxu0 %v779_v32 }
 0x188   :  { %v717_v19 = vpop.f32.mrf.mxu1 }
 0x189   :  { %v2450_v39 = vadd.f32 %v717_v19, %v2399_v9 }
 0x18a   :  { %v721_v56 = vpop.f32.mrf.mxu1 }
 0x18b   :  { %v2461_v6 = vadd.f32 %v721_v56, %v2389_v16  ;;  %v3000_v56 = vpack.c.bf16 %v2339_v8, %v2334_v27  ;;  %v3003_v27 = vpack.c.bf16 %v2315_v59, %v2312_v43  ;;  %v3004_v8 = vpack.c.bf16 %v2305_v22, %v2297_v58 }
 0x18c   :  { %v2458_v32 = vpop.f32.mrf.mxu1 }
 0x18e   :  { %v725_v0 = vpop.f32.mrf.mxu1  ;;  %837 = vmatpush1.bf16.xpose.msra.mxu0 %v778_v3 }
 0x18f   :  { %v2464_v19 = vadd.f32 %v725_v0, %v2384_v24  ;;  %838 = vmatprep.subr.bf16.mxu0 %v777_v17 }
 0x190   :  { %v2466_v10 = vpop.f32.mrf.mxu1 }
 0x192   :  { %v2470_v35 = vpop.f32.mrf.mxu1 }
 0x194   :  { %v733_v11 = vpop.f32.mrf.mxu1 }
 0x196   :  { %v2472_v34 = vpop.f32.mrf.mxu1  ;;  %839 = vmatpush1.bf16.xpose.msra.mxu0 %v2999_v40 }
 0x197   :  { %840 = vmatprep.subr.bf16.mxu0 %v3000_v56 }
 0x198   :  { %v737_v63 = vpop.f32.mrf.mxu1 }
 0x19a   :  { %v741_v3 = vpop.f32.mrf.mxu1 }
 0x19c   :  { %v743_v17 = vpop.f32.mrf.mxu1 }
 0x19e   :  { %v745_v0 = vpop.f32.mrf.mxu1  ;;  %841 = vmatpush1.bf16.xpose.msra.mxu0 %v3001_v31 }
 0x19f   :  { %842 = vmatprep.subr.bf16.mxu0 %v3002_v2 }
 0x1a0   :  { %v747_v9 = vpop.f32.mrf.mxu1 }
 0x1a2   :  { %v751_v48 = vpop.f32.mrf.mxu1 }
 0x1a4   :  { %v753_v23 = vpop.f32.mrf.mxu1 }
 0x1a6   :  { %v755_v36 = vpop.f32.mrf.mxu1  ;;  %843 = vmatpush1.bf16.xpose.msra.mxu0 %v3003_v27  ;;  %v754_v27 = vadd.f32 %v753_v23, %v2373_v21 }
 0x1a7   :  { %844 = vmatprep.subr.bf16.mxu0 %v3004_v8 }
 0x1a8   :  { %v757_v40 = vpop.f32.mrf.mxu1 }
 0x1a9   :  { %v758_v2 = vadd.f32 %v757_v40, %v2371_v37 }
 0x1aa   :  { %v761_v56 = vpop.f32.mrf.mxu1 }
 0x1ab   :  { %v762_v58 = vadd.f32 %v761_v56, %v2369_v46  ;;  %v799_v38 = vpack.c.bf16 %v758_v2, %v754_v27 }
 0x1ac   :  { %v763_v20 = vpop.f32.mrf.mxu1 }
 0x1ad   :  { %v764_v43 = vadd.f32 %v763_v20, %v2369_v46  ;;  %v756_v20 = vadd.f32 %v755_v36, %v2371_v37  ;;  %v738_v36 = vadd.f32 %v737_v63, %v2379_v52 }
 0x1ae   :  { %v765_v25 = vpop.f32.mrf.mxu1  ;;  %845 = vmatpush1.bf16.xpose.msra.mxu0 %v3005_v4 }
 0x1af   :  { %v766_v51 = vadd.f32 %v765_v25, %v2367_v45  ;;  %v748_v25 = vadd.f32 %v747_v9, %v2375_v15  ;;  %v746_v9 = vadd.f32 %v745_v0, %v2375_v15 }
 0x1b0   :  { %v767_v31 = vpop.f32.mrf.mxu1 }
 0x1b1   :  { %v768_v59 = vadd.f32 %v767_v31, %v2367_v45  ;;  %v800_v57 = vpack.c.bf16 %v766_v51, %v762_v58 }
 0x1b2   :  { %v1074_v22 = vpop.f32.mrf.mxu1 }
 0x1b3   :  { %v801_v8 = vpack.c.bf16 %v768_v59, %v764_v43  ;;  %v2502_v7 = vadd.f32 %v1074_v22, %v2265_v29  ;;  %v3006_v43 = vld [vmem:[#allocation53_spill] sm:$0xff] }
 0x1b4   :  { %v1076_v47 = vpop.f32.mrf.mxu1  ;;  %v734_v59 = vadd.f32 %v733_v11, %v3006_v43  ;;  %v728_v11 = vadd.f32 %v2466_v10, %v2384_v24 }
 0x1b5   :  { %v2505_v30 = vadd.f32 %v1076_v47, %v2265_v29  ;;  %846 = vmatprep.subr.bf16.mxu0 %v801_v8  ;;  %v752_v47 = vadd.f32 %v751_v48, %v2373_v21  ;;  %v3007_v48 = vld [vmem:[#allocation47_spill] sm:$0xff] }
 0x1b6   :  { %847 = vmatpush2.bf16.xpose.msra.mxu0 %v800_v57  ;;  %v1078_v40 = vpop.f32.mrf.mxu1  ;;  %v744_v57 = vadd.f32 %v743_v17, %v2377_v13  ;;  %v3008_v17 = vld [vmem:[#allocation50_spill] sm:$0xff]  ;;  %v795_v8 = vpack.c.bf16 %v738_v36, %v734_v59 }
 0x1b7   :  { %848 = vmatprep.subr.bf16.mxu0 %v799_v38  ;;  %v1308_v56 = vmax.f32 %v2502_v7, %v2505_v30  ;;  %v2512_v4 = vadd.f32 %v1078_v40, %v2263_v14  ;;  %v798_v38 = vpack.c.bf16 %v756_v20, %v752_v47 }
 0x1b8   :  { %v1080_v23 = vpop.f32.mrf.mxu1  ;;  %v797_v31 = vpack.c.bf16 %v748_v25, %v744_v57  ;;  %v3010_v25 = vld [vmem:[#allocation52_spill] sm:$0xff] }
 0x1b9   :  { %v2515_v51 = vadd.f32 %v1080_v23, %v2263_v14  ;;  %1309 = vmax.xlane.f32.xlu0 %v1308_v56  ;;  %v742_v14 = vadd.f32 %v741_v3, %v2377_v13  ;;  %v3009_v23 = vld [vmem:[#allocation51_spill] sm:$0xff]  ;;  %v736_v3 = vadd.f32 %v2472_v34, %v2379_v52 }
 0x1bb   :  { %v1311_v29 = vmax.f32 %v2512_v4, %v2515_v51  ;;  %v796_v27 = vpack.c.bf16 %v746_v9, %v742_v14  ;;  %v3011_v14 = vpack.c.bf16 %v2464_v19, %v2461_v6  ;;  %v3013_v6 = vpack.c.bf16 %v2438_v33, %v2435_v55 }
 0x1bc   :  { %v3014_v19 = vpack.c.bf16 %v2427_v18, %v2422_v1  ;;  %v3016_v18 = vld [vmem:[#allocation23_spill] sm:$0xff] }
 0x1bd   :  { %1312 = vmax.xlane.f32.xlu1 %v1311_v29  ;;  %v732_v29 = vadd.f32 %v2470_v35, %v3006_v43 }
 0x1be   :  { %849 = vmatpush2.bf16.xpose.msra.mxu0 %v798_v38  ;;  %v724_v38 = vadd.f32 %v2458_v32, %v2389_v16 }
 0x1bf   :  { %850 = vmatprep.subr.bf16.mxu0 %v797_v31  ;;  %v794_v31 = vpack.c.bf16 %v736_v3, %v732_v29  ;;  %v3030_v3 = vld [vmem:[#allocation11_spill] sm:$0xff]  ;;  %v3034_v29 = vld [vmem:[#allocation22_spill] sm:$0xff] }
 0x1c0   :  { %v793_v9 = vpack.c.bf16 %v728_v11, %v724_v38  ;;  %v3031_v11 = vld [vmem:[#allocation15_spill] sm:$0xff]  ;;  %v3035_v38 = vld [vmem:[#allocation25_spill] sm:$0xff] }
 0x1c2   :  { %v804_v2 = vpop.xlane.xlu0 %803 }
 0x1c3   :  { %v808_v58 = vsub.f32 %v3007_v48, %v804_v2  ;;  %v809_v22 = vsub.f32 %v3008_v17, %v804_v2  ;;  %v3012_v2 = vpack.c.bf16 %v2450_v39, %v2445_v60 }
 0x1c5   :  { %v812_v40 = vmul.f32 1.442695, %v808_v58  ;;  %v814_v56 = vmul.f32 1.442695, %v809_v22 }
 0x1c6   :  { %851 = vmatpush2.bf16.xpose.msra.mxu0 %v796_v27  ;;  %v807_v20 = vpop.xlane.xlu1 %806  ;;  %v3015_v27 = vpack.c.bf16 %v2417_v53, %v2414_v5  ;;  %v3020_v53 = vld [vmem:[#allocation27_spill] sm:$0xff]  ;;  %v3021_v5 = vld [vmem:[#allocation28_spill] sm:$0xff] }
 0x1c7   :  { %1454 = vpow2.f32 %v812_v40  ;;  %v810_v0 = vsub.f32 %v3009_v23, %v807_v20  ;;  %v811_v63 = vsub.f32 %v3010_v25, %v807_v20  ;;  %852 = vmatprep.subr.bf16.mxu0 %v795_v8  ;;  %v3017_v8 = vld [vmem:[#allocation26_spill] sm:$0xff]  ;;  %v3019_v40 = vld [vmem:[#allocation24_spill] sm:$0xff]  ;;  %v3028_v25 = vld [vmem:[#allocation19_spill] sm:$0xff] }
 0x1c8   :  { %1456 = vpow2.f32 %v814_v56  ;;  %v3023_v56 = vld [vmem:[#allocation30_spill] sm:$0xff]  ;;  %v3025_v20 = vld [vmem:[#allocation20_spill] sm:$0xff] }
 0x1c9   :  { %v816_v47 = vmul.f32 1.442695, %v810_v0  ;;  %v818_v57 = vmul.f32 1.442695, %v811_v63  ;;  %v3026_v23 = vld [vmem:[#allocation12_spill] sm:$0xff]  ;;  %v3029_v63 = vld [vmem:[#allocation10_spill] sm:$0xff] }
 0x1ca   :  { %v2543_v58 = vpop.permute.xlu1 %408  ;;  %v2545_v17 = vpop.permute.xlu0 %403  ;;  %v3027_v0 = vld [vmem:[#allocation16_spill] sm:$0xff] }
 0x1cb   :  { %1458 = vpow2.f32 %v816_v47  ;;  %v698_v60 = vadd.f32 %v2404_v62, %v2543_v58  ;;  %v694_v39 = vadd.f32 %v2395_v12, %v2545_v17  ;;  %v696_v55 = vadd.f32 %v2397_v26, %v2543_v58  ;;  %v3022_v26 = vld [vmem:[#allocation29_spill] sm:$0xff]  ;;  %v3032_v47 = vld [vmem:[#allocation8_spill] sm:$0xff] }
 0x1cc   :  { %1460 = vpow2.f32 %v818_v57  ;;  %v692_v33 = vadd.f32 %v2392_v42, %v2545_v17  ;;  %v3018_v12 = vmov 0   ;;  %v3024_v42 = vld [vmem:[#allocation32_spill] sm:$0xff]  ;;  %v3033_v57 = vld [vmem:[#allocation21_spill] sm:$0xff] }
 0x1cd   :  { %v787_v22 = vpack.c.bf16 %v698_v60, %v694_v39 }
 0x1ce   :  { %853 = vmatpush2.bf16.xpose.msra.mxu0 %v794_v31  ;;  %v786_v1 = vpack.c.bf16 %v696_v55, %v692_v33  ;;  %v3036_v31 = vld [vmem:[#allocation31_spill] sm:$0xff] }
 0x1cf   :  { %854 = vmatprep.subr.bf16.mxu0 %v793_v9  ;;  %v3037_v9 = vld [vmem:[#allocation18_spill] sm:$0xff] }
 0x1d4   :  { %v1455_v36 = vpop.eup %1454 }
 0x1d5   :  { %v1457_v34 = vpop.eup %1456 }
 0x1d6   :  { %855 = vmatpush2.bf16.xpose.msra.mxu0 %v3011_v14  ;;  %v820_v10 = vadd.f32 %v1457_v34, %v1455_v36 }
 0x1d7   :  { %856 = vmatprep.subr.bf16.mxu0 %v3012_v2 }
 0x1d8   :  { %v1459_v35 = vpop.eup %1458  ;;  %821 = vadd.xlane.f32.xlu0 %v820_v10 }
 0x1d9   :  { %v1461_v32 = vpop.eup %1460  ;;  %v828_v62 = vpack.c.bf16 %v1459_v35, %v1455_v36  ;;  %v3038_v36 = vld [vmem:[#allocation17_spill] sm:$0xff] }
 0x1da   :  { %v829_v59 = vpack.c.bf16 %v1461_v32, %v1457_v34  ;;  %v823_v48 = vadd.f32 %v1461_v32, %v1459_v35  ;;  %v3039_v32 = vld [vmem:[#allocation9_spill] sm:$0xff] }
 0x1dc   :  { %862 = vmatprep.mubr.bf16.mxu0 %v829_v59  ;;  %824 = vadd.xlane.f32.xlu0 %v823_v48 }
 0x1de   :  { %857 = vmatpush2.bf16.xpose.msra.mxu0 %v3013_v6 }
 0x1df   :  { %858 = vmatprep.subr.bf16.mxu0 %v3014_v19 }
 0x1e6   :  { %859 = vmatpush2.bf16.xpose.msra.mxu0 %v3015_v27 }
 0x1e7   :  { %860 = vmatprep.subr.bf16.mxu0 %v787_v22  ;;  %v3042_v22 = vld [vmem:[#allocation14_spill] sm:$0xff] }
 0x1ee   :  { %861 = vmatpush2.bf16.xpose.msra.mxu0 %v786_v1 }
 0x1ef   :  { %1083 = vmatprep.subr.bf16.mxu0 %v3016_v18  ;;  %v3044_v18 = vld [vmem:[#allocation33_spill] sm:$0xff] }
 0x1f5   :  { %863 = vmatmul.mubr.bf16.vlgmr.msra.gmra.mxu0 %v828_v62  ;;  %v3045_v62 = vld [vmem:[#allocation34_spill] sm:$0xff] }
 0x1f6   :  { %1084 = vmatpush1.bf16.msra.mxu0 %v3017_v8  ;;  %1115 = vmatprep.mubr.bf16.mxu0 %v3018_v12  ;;  %v3046_v8 = vld [vmem:[#allocation35_spill] sm:$0xff] }
 0x1f7   :  { %1085 = vmatprep.subr.bf16.mxu0 %v3019_v40  ;;  %v3047_v40 = vld [vmem:[#allocation36_spill] sm:$0xff] }
 0x1fa   :  { %1086 = vmatpush1.bf16.msra.mxu0 %v3020_v53  ;;  %v3048_v53 = vld [vmem:[#allocation37_spill] sm:$0xff] }
 0x1fb   :  { %1087 = vmatprep.subr.bf16.mxu0 %v3021_v5  ;;  %v3049_v5 = vld [vmem:[#allocation38_spill] sm:$0xff] }
 0x1fe   :  { %1088 = vmatpush1.bf16.msra.mxu0 %v3022_v26  ;;  %v3050_v26 = vld [vmem:[#allocation39_spill] sm:$0xff] }
 0x1ff   :  { %1089 = vmatprep.subr.bf16.mxu0 %v3023_v56 }
 0x202   :  { %1090 = vmatpush1.bf16.msra.mxu0 %v3024_v42 }
 0x203   :  { %1091 = vmatprep.subr.bf16.mxu0 %v3025_v20 }
 0x206   :  { %1092 = vmatpush1.bf16.msra.mxu0 %v3026_v23 }
 0x207   :  { %1093 = vmatprep.subr.bf16.mxu0 %v3027_v0 }
 0x20a   :  { %1094 = vmatpush1.bf16.msra.mxu0 %v3028_v25 }
 0x20b   :  { %1095 = vmatprep.subr.bf16.mxu0 %v3029_v63 }
 0x20e   :  { %1096 = vmatpush1.bf16.msra.mxu0 %v3030_v3 }
 0x20f   :  { %1097 = vmatprep.subr.bf16.mxu0 %v3031_v11 }
 0x212   :  { %1098 = vmatpush1.bf16.msra.mxu0 %v3032_v47 }
 0x215   :  { %1116 = vmatmul.mubr.bf16.vlgmr.msra.gmra.mxu0 %v3033_v57 }
 0x216   :  { %1125 = vmatprep.mubr.bf16.mxu0 %v3018_v12 }
 0x21d   :  { %1126 = vmatmul.mubr.bf16.gmra.mxu0 %v3034_v29 }
 0x21e   :  { %1135 = vmatprep.mubr.bf16.mxu0 %v3018_v12 }
 0x225   :  { %1136 = vmatmul.mubr.bf16.gmra.mxu0 %v3035_v38 }
 0x226   :  { %1145 = vmatprep.mubr.bf16.mxu0 %v3018_v12 }
 0x22d   :  { %1146 = vmatmul.mubr.bf16.gmra.mxu0 %v3036_v31 }
 0x22e   :  { %1155 = vmatprep.mubr.bf16.mxu0 %v3018_v12 }
 0x235   :  { %1156 = vmatmul.mubr.bf16.gmra.mxu0 %v3037_v9  ;;  %v3051_v9 = vld [vmem:[#allocation49_spill] sm:$0xff] }
 0x236   :  { %1165 = vmatprep.mubr.bf16.mxu0 %v3018_v12 }
 0x23d   :  { %1166 = vmatmul.mubr.bf16.gmra.mxu0 %v3038_v36 }
 0x23e   :  { %1175 = vmatprep.mubr.bf16.mxu0 %v3018_v12 }
 0x242   :  { %v1310_v34 = vpop.xlane.xlu0 %1309 }
 0x243   :  { %v1314_v14 = vsub.f32 %v2502_v7, %v1310_v34  ;;  %v1315_v10 = vsub.f32 %v2505_v30, %v1310_v34  ;;  %v3040_v7 = vld [vmem:[#allocation13_spill] sm:$0xff]  ;;  %v3052_v34 = vld [vmem:[#allocation48_spill] sm:$0xff] }
 0x245   :  { %v1318_v2 = vmul.f32 1.442695, %v1314_v14  ;;  %v1320_v35 = vmul.f32 1.442695, %v1315_v10  ;;  %1176 = vmatmul.mubr.bf16.gmra.mxu0 %v3039_v32 }
 0x246   :  { %v1313_v59 = vpop.xlane.xlu1 %1312  ;;  %1185 = vmatprep.mubr.bf16.mxu0 %v3018_v12 }
 0x247   :  { %1462 = vpow2.f32 %v1318_v2  ;;  %v1316_v48 = vsub.f32 %v2512_v4, %v1313_v59  ;;  %v1317_v6 = vsub.f32 %v2515_v51, %v1313_v59 }
 0x248   :  { %1464 = vpow2.f32 %v1320_v35 }
 0x249   :  { %v1322_v19 = vmul.f32 1.442695, %v1316_v48  ;;  %v1324_v60 = vmul.f32 1.442695, %v1317_v6 }
 0x24b   :  { %1466 = vpow2.f32 %v1322_v19 }
 0x24c   :  { %1468 = vpow2.f32 %v1324_v60  ;;  %v3053_v60 = vld [vmem:[#allocation46_spill] sm:$0xff] }
 0x24d   :  { %1186 = vmatmul.mubr.bf16.gmra.mxu0 %v3040_v7 }
 0x24e   :  { %1195 = vmatprep.mubr.bf16.mxu0 %v3018_v12 }
 0x254   :  { %v2601_v30 = vpop.eup %1462 }
 0x255   :  { %3041 = vst [vmem:[#allocation53_spill] sm:$0xff] %v2601_v30  ;;  %v1465_v39 = vpop.eup %1464  ;;  %1196 = vmatmul.mubr.bf16.gmra.mxu0 %v3042_v22 }
 0x256   :  { %v1326_v27 = vadd.f32 %v1465_v39, %v2601_v30  ;;  %1205 = vmatprep.mubr.bf16.mxu0 %v3018_v12 }
 0x258   :  { %v2606_v4 = vpop.eup %1466  ;;  %1327 = vadd.xlane.f32.xlu1 %v1326_v27 }
 0x259   :  { %3043 = vst [vmem:[#allocation47_spill] sm:$0xff] %v2606_v4  ;;  %v1469_v51 = vpop.eup %1468 }
 0x25a   :  { %v1329_v33 = vadd.f32 %v1469_v51, %v2606_v4  ;;  %v1335_v1 = vpack.c.bf16 %v1469_v51, %v1465_v39  ;;  %v3054_v39 = vld [vmem:[#allocation45_spill] sm:$0xff] }
 0x25c   :  { %1330 = vadd.xlane.f32.xlu0 %v1329_v33  ;;  %1368 = vmatprep.mubr.bf16.mxu1 %v1335_v1 }
 0x25d   :  { %1206 = vmatmul.mubr.bf16.gmra.mxu0 %v3044_v18 }
 0x25e   :  { %1215 = vmatprep.mubr.bf16.mxu0 %v3018_v12 }
 0x261   :  { %v822_v56 = vpop.xlane.xlu0 %821 }
 0x262   :  { %1470 = vrcp.f32 %v822_v56 }
 0x265   :  { %1216 = vmatmul.mubr.bf16.gmra.mxu0 %v3045_v62  ;;  %v825_v42 = vpop.xlane.xlu0 %824 }
 0x266   :  { %1225 = vmatprep.mubr.bf16.mxu0 %v3018_v12  ;;  %1472 = vrcp.f32 %v825_v42 }
 0x26d   :  { %1226 = vmatmul.mubr.bf16.gmra.mxu0 %v3046_v8 }
 0x26e   :  { %1235 = vmatprep.mubr.bf16.mxu0 %v3018_v12 }
 0x26f   :  { %v1471_v20 = vpop.eup %1470 }
 0x273   :  { %v1473_v3 = vpop.eup %1472 }
 0x275   :  { %1236 = vmatmul.mubr.bf16.gmra.mxu0 %v3047_v40 }
 0x276   :  { %1245 = vmatprep.mubr.bf16.mxu0 %v3018_v12 }
 0x27d   :  { %1246 = vmatmul.mubr.bf16.gmra.mxu0 %v3048_v53  ;;  %v3055_v53 = vld [vmem:[#allocation44_spill] sm:$0xff] }
 0x27e   :  { %1255 = vmatprep.mubr.bf16.mxu0 %v3018_v12 }
 0x285   :  { %1256 = vmatmul.mubr.bf16.gmra.mxu0 %v3049_v5 }
 0x286   :  { %1265 = vmatprep.mubr.bf16.mxu0 %v3018_v12 }
 0x28d   :  { %1266 = vmatmul.mubr.bf16.gmra.mxu0 %v3050_v26  ;;  %v3056_v26 = vld [vmem:[#allocation43_spill] sm:$0xff] }
 0x2b5   :  { %v864_v23 = vpop.f32.mrf.mxu0 }
 0x2b6   :  { %v873_v0 = vmul.f32 %v1471_v20, %v864_v23 }
 0x2b7   :  { %v866_v25 = vpop.f32.mrf.mxu0 }
 0x2b8   :  { %877 = vst [vmem:[#allocation5] sm:$0xff] %v873_v0  ;;  %v874_v63 = vmul.f32 %v1471_v20, %v866_v25 }
 0x2b9   :  { %v868_v11 = vpop.f32.mrf.mxu0 }
 0x2ba   :  { %878 = vst [vmem:[#allocation5 + $0x8] sm:$0xff] %v874_v63  ;;  %v875_v47 = vmul.f32 %v1473_v3, %v868_v11 }
 0x2bb   :  { %v870_v57 = vpop.f32.mrf.mxu0 }
 0x2bc   :  { %879 = vst [vmem:[#allocation5 + $0x10] sm:$0xff] %v875_v47  ;;  %v876_v29 = vmul.f32 %v1473_v3, %v870_v57 }
 0x2be   :  { %880 = vst [vmem:[#allocation5 + $0x18] sm:$0xff] %v876_v29 }
 0x2d5   :  { %v1117_v12 = vpop.f32.mrf.mxu0 }
 0x2d6   :  { %v2625_v36 = vadd.f32 %v1117_v12, %v3051_v9 }
 0x2d7   :  { %v1119_v38 = vpop.f32.mrf.mxu0 }
 0x2d8   :  { %v2631_v2 = vadd.f32 %v1119_v38, %v3051_v9 }
 0x2d9   :  { %v1121_v31 = vpop.f32.mrf.mxu0 }
 0x2da   :  { %v2628_v14 = vadd.f32 %v1121_v31, %v3052_v34 }
 0x2db   :  { %v1123_v10 = vpop.f32.mrf.mxu0 }
 0x2dc   :  { %v2636_v32 = vadd.f32 %v1123_v10, %v3052_v34 }
 0x2dd   :  { %v1127_v59 = vpop.f32.mrf.mxu0 }
 0x2de   :  { %v2641_v7 = vadd.f32 %v1127_v59, %v3053_v60 }
 0x2df   :  { %v1129_v6 = vpop.f32.mrf.mxu0 }
 0x2e0   :  { %v2647_v51 = vadd.f32 %v1129_v6, %v3053_v60 }
 0x2e1   :  { %v1131_v19 = vpop.f32.mrf.mxu0 }
 0x2e2   :  { %v2644_v22 = vadd.f32 %v1131_v19, %v3054_v39 }
 0x2e3   :  { %v1133_v27 = vpop.f32.mrf.mxu0 }
 0x2e4   :  { %v2652_v1 = vadd.f32 %v1133_v27, %v3054_v39 }
 0x2e5   :  { %v1137_v18 = vpop.f32.mrf.mxu0 }
 0x2e6   :  { %v2657_v5 = vadd.f32 %v1137_v18, %v3055_v53 }
 0x2e7   :  { %v1139_v8 = vpop.f32.mrf.mxu0 }
 0x2e8   :  { %v2663_v20 = vadd.f32 %v1139_v8, %v3055_v53 }
 0x2e9   :  { %v1141_v40 = vpop.f32.mrf.mxu0 }
 0x2ea   :  { %v2660_v56 = vadd.f32 %v1141_v40, %v3056_v26 }
 0x2eb   :  { %v1143_v42 = vpop.f32.mrf.mxu0 }
 0x2ec   :  { %v2668_v0 = vadd.f32 %v1143_v42, %v3056_v26 }
 0x2ed   :  { %v1147_v25 = vpop.f32.mrf.mxu0 }
 0x2ee   :  { %v2675_v47 = vadd.f32 %v1147_v25, %v2261_v54 }
 0x2ef   :  { %v2672_v3 = vpop.f32.mrf.mxu0 }
 0x2f1   :  { %v1151_v11 = vpop.f32.mrf.mxu0 }
 0x2f2   :  { %v2678_v57 = vadd.f32 %v1151_v11, %v2259_v41  ;;  %v3057_v11 = vld [vmem:[#allocation40_spill] sm:$0xff] }
 0x2f3   :  { %v2680_v29 = vpop.f32.mrf.mxu0 }
 0x2f5   :  { %v2684_v38 = vpop.f32.mrf.mxu0 }
 0x2f7   :  { %v1159_v31 = vpop.f32.mrf.mxu0 }
 0x2f9   :  { %v2686_v9 = vpop.f32.mrf.mxu0 }
 0x2fb   :  { %v1163_v34 = vpop.f32.mrf.mxu0 }
 0x2fd   :  { %v1167_v10 = vpop.f32.mrf.mxu0 }
 0x2ff   :  { %v1169_v59 = vpop.f32.mrf.mxu0 }
 0x301   :  { %v1171_v6 = vpop.f32.mrf.mxu0 }
 0x303   :  { %v1173_v19 = vpop.f32.mrf.mxu0 }
 0x305   :  { %v1177_v60 = vpop.f32.mrf.mxu0 }
 0x307   :  { %v1179_v39 = vpop.f32.mrf.mxu0 }
 0x308   :  { %v1180_v62 = vadd.f32 %v1179_v39, %v2245_v49  ;;  %v3059_v39 = vld [vmem:[#allocation56_spill] sm:$0xff] }
 0x309   :  { %v1181_v27 = vpop.f32.mrf.mxu0 }
 0x30b   :  { %v1183_v18 = vpop.f32.mrf.mxu0 }
 0x30c   :  { %v1184_v25 = vadd.f32 %v1183_v18, %v2249_v28 }
 0x30d   :  { %v1187_v8 = vpop.f32.mrf.mxu0 }
 0x30e   :  { %v1188_v48 = vadd.f32 %v1187_v8, %v3057_v11  ;;  %v1289_v30 = vpack.c.bf16 %v1184_v25, %v1180_v62 }
 0x30f   :  { %v1189_v40 = vpop.f32.mrf.mxu0 }
 0x310   :  { %v1190_v55 = vadd.f32 %v1189_v40, %v3057_v11  ;;  %v1174_v40 = vadd.f32 %v1173_v19, %v2251_v50  ;;  %v1168_v11 = vadd.f32 %v1167_v10, %v2253_v44 }
 0x311   :  { %v1191_v53 = vpop.f32.mrf.mxu0 }
 0x312   :  { %v1192_v26 = vadd.f32 %v1191_v53, %v2247_v61 }
 0x313   :  { %v1193_v42 = vpop.f32.mrf.mxu0 }
 0x314   :  { %v1194_v35 = vadd.f32 %v1193_v42, %v2247_v61  ;;  %v1290_v63 = vpack.c.bf16 %v1192_v26, %v1188_v48  ;;  %v1182_v61 = vadd.f32 %v1181_v27, %v2249_v28 }
 0x315   :  { %v1197_v33 = vpop.f32.mrf.mxu0 }
 0x316   :  { %v1291_v23 = vpack.c.bf16 %v1194_v35, %v1190_v55  ;;  %v2695_v53 = vadd.f32 %v1197_v33, %v2545_v17  ;;  %v1178_v33 = vadd.f32 %v1177_v60, %v2245_v49  ;;  %v1172_v49 = vadd.f32 %v1171_v6, %v2251_v50  ;;  %v3060_v60 = vld [vmem:[#allocation41_spill] sm:$0xff] }
 0x317   :  { %v1199_v12 = vpop.f32.mrf.mxu0 }
 0x318   :  { %1336 = vmatprep.subr.bf16.mxu1 %v1291_v23  ;;  %v2703_v55 = vadd.f32 %v1199_v12, %v2545_v17  ;;  %v3058_v17 = vld [vmem:[#allocation57_spill] sm:$0xff]  ;;  %v1286_v6 = vpack.c.bf16 %v1172_v49, %v1168_v11 }
 0x319   :  { %v1201_v4 = vpop.f32.mrf.mxu0  ;;  %1337 = vmatpush1.bf16.xpose.msra.mxu1 %v1290_v63 }
 0x31a   :  { %v2698_v18 = vadd.f32 %v1201_v4, %v2543_v58  ;;  %1338 = vmatprep.subr.bf16.mxu1 %v1289_v30  ;;  %v1170_v4 = vadd.f32 %v1169_v59, %v2253_v44  ;;  %v1288_v30 = vpack.c.bf16 %v1182_v61, %v1178_v33  ;;  %v1164_v59 = vadd.f32 %v1163_v34, %v3060_v60 }
 0x31b   :  { %v1203_v8 = vpop.f32.mrf.mxu0  ;;  %v1162_v44 = vadd.f32 %v2686_v9, %v3060_v60  ;;  %v1150_v9 = vadd.f32 %v2672_v3, %v2261_v54 }
 0x31c   :  { %v1292_v35 = vpack.c.bf16 %v2698_v18, %v2695_v53  ;;  %v2708_v48 = vadd.f32 %v1203_v8, %v2543_v58  ;;  %v1287_v63 = vpack.c.bf16 %v1174_v40, %v1170_v4  ;;  %v3061_v8 = vld [vmem:[#allocation42_spill] sm:$0xff]  ;;  %v3062_v4 = vld [vmem:[#allocation55_spill] sm:$0xff] }
 0x31d   :  { %v1207_v62 = vpop.f32.mrf.mxu0  ;;  %v1160_v40 = vadd.f32 %v1159_v31, %v3061_v8  ;;  %v1154_v31 = vadd.f32 %v2680_v29, %v2259_v41  ;;  %v1158_v49 = vadd.f32 %v2684_v38, %v3061_v8 }
 0x31e   :  { %v1293_v28 = vpack.c.bf16 %v2708_v48, %v2703_v55  ;;  %v2715_v12 = vadd.f32 %v1207_v62, %v3058_v17 }
 0x31f   :  { %v1209_v23 = vpop.f32.mrf.mxu0  ;;  %v1285_v34 = vpack.c.bf16 %v1164_v59, %v1160_v40  ;;  %v1284_v41 = vpack.c.bf16 %v1162_v44, %v1158_v49  ;;  %v1283_v59 = vpack.c.bf16 %v1154_v31, %v1150_v9  ;;  %v3067_v31 = vpack.c.bf16 %v2652_v1, %v2647_v51 }
 0x320   :  { %v2723_v26 = vadd.f32 %v1209_v23, %v3058_v17  ;;  %v3063_v23 = vld [vmem:[#allocation54_spill] sm:$0xff]  ;;  %v3070_v51 = vpack.c.bf16 %v2628_v14, %v2625_v36 }
 0x321   :  { %v1211_v19 = vpop.f32.mrf.mxu0  ;;  %1339 = vmatpush1.bf16.xpose.msra.mxu1 %v1288_v30 }
 0x322   :  { %v2718_v27 = vadd.f32 %v1211_v19, %v3059_v39  ;;  %1340 = vmatprep.subr.bf16.mxu1 %v1287_v63 }
 0x323   :  { %v1213_v58 = vpop.f32.mrf.mxu0 }
 0x324   :  { %v1294_v42 = vpack.c.bf16 %v2718_v27, %v2715_v12  ;;  %v2728_v25 = vadd.f32 %v1213_v58, %v3059_v39 }
 0x325   :  { %v1217_v61 = vpop.f32.mrf.mxu0 }
 0x326   :  { %v1295_v50 = vpack.c.bf16 %v2728_v25, %v2723_v26  ;;  %v2735_v30 = vadd.f32 %v1217_v61, %v3062_v4 }
 0x327   :  { %v1219_v33 = vpop.f32.mrf.mxu0 }
 0x328   :  { %v2745_v19 = vadd.f32 %v1219_v33, %v3062_v4  ;;  %v3064_v33 = vpack.c.bf16 %v2678_v57, %v2675_v47 }
 0x329   :  { %v1221_v62 = vpop.f32.mrf.mxu0  ;;  %1341 = vmatpush1.bf16.xpose.msra.mxu1 %v1286_v6 }
 0x32a   :  { %v2738_v63 = vadd.f32 %v1221_v62, %v3063_v23  ;;  %1342 = vmatprep.subr.bf16.mxu1 %v1285_v34  ;;  %v3065_v34 = vpack.c.bf16 %v2668_v0, %v2663_v20  ;;  %v3068_v20 = vpack.c.bf16 %v2644_v22, %v2641_v7  ;;  %v3069_v0 = vpack.c.bf16 %v2636_v32, %v2631_v2 }
 0x32b   :  { %v1223_v10 = vpop.f32.mrf.mxu0 }
 0x32c   :  { %v1296_v17 = vpack.c.bf16 %v2738_v63, %v2735_v30  ;;  %v2750_v39 = vadd.f32 %v1223_v10, %v3063_v23  ;;  %v3066_v10 = vpack.c.bf16 %v2660_v56, %v2657_v5 }
 0x32d   :  { %v1227_v58 = vpop.f32.mrf.mxu0 }
 0x32e   :  { %v1297_v60 = vpack.c.bf16 %v2750_v39, %v2745_v19  ;;  %v2761_v61 = vadd.f32 %v1227_v58, %v2389_v16 }
 0x32f   :  { %v2758_v29 = vpop.f32.mrf.mxu0 }
 0x331   :  { %v1231_v11 = vpop.f32.mrf.mxu0  ;;  %1343 = vmatpush1.bf16.xpose.msra.mxu1 %v1284_v41 }
 0x332   :  { %v2764_v40 = vadd.f32 %v1231_v11, %v2384_v24  ;;  %1344 = vmatprep.subr.bf16.mxu1 %v1283_v59 }
 0x333   :  { %v1233_v38 = vpop.f32.mrf.mxu0 }
 0x334   :  { %v1298_v54 = vpack.c.bf16 %v2764_v40, %v2761_v61 }
 0x335   :  { %v1237_v3 = vpop.f32.mrf.mxu0 }
 0x337   :  { %v1239_v8 = vpop.f32.mrf.mxu0 }
 0x339   :  { %v1241_v6 = vpop.f32.mrf.mxu0  ;;  %1345 = vmatpush1.bf16.xpose.msra.mxu1 %v3064_v33 }
 0x33a   :  { %1346 = vmatprep.subr.bf16.mxu1 %v3065_v34 }
 0x33b   :  { %v1243_v62 = vpop.f32.mrf.mxu0 }
 0x33d   :  { %v1247_v4 = vpop.f32.mrf.mxu0 }
 0x33f   :  { %v1249_v23 = vpop.f32.mrf.mxu0 }
 0x341   :  { %v1251_v44 = vpop.f32.mrf.mxu0  ;;  %1347 = vmatpush1.bf16.xpose.msra.mxu1 %v3066_v10  ;;  %v1250_v10 = vadd.f32 %v1249_v23, %v2377_v13  ;;  %v1234_v23 = vadd.f32 %v1233_v38, %v2384_v24  ;;  %v3072_v24 = vld [vmem:[#allocation53_spill] sm:$0xff] }
 0x342   :  { %1348 = vmatprep.subr.bf16.mxu1 %v3067_v31 }
 0x343   :  { %v1253_v49 = vpop.f32.mrf.mxu0 }
 0x344   :  { %v1254_v14 = vadd.f32 %v1253_v49, %v2375_v15  ;;  %v1238_v49 = vadd.f32 %v1237_v3, %v3006_v43 }
 0x345   :  { %v1257_v58 = vpop.f32.mrf.mxu0 }
 0x346   :  { %v1258_v34 = vadd.f32 %v1257_v58, %v2373_v21  ;;  %v1230_v58 = vadd.f32 %v2758_v29, %v2389_v16  ;;  %v3071_v16 = vld [vmem:[#allocation47_spill] sm:$0xff] }
 0x347   :  { %v1259_v47 = vpop.f32.mrf.mxu0 }
 0x348   :  { %v1260_v32 = vadd.f32 %v1259_v47, %v2373_v21  ;;  %v1244_v47 = vadd.f32 %v1243_v62, %v2379_v52  ;;  %v1242_v21 = vadd.f32 %v1241_v6, %v2379_v52  ;;  %v3073_v52 = vpack.c.bf16 %v3071_v16, %v3072_v24 }
 0x349   :  { %v1261_v57 = vpop.f32.mrf.mxu0  ;;  %1349 = vmatpush1.bf16.xpose.msra.mxu1 %v3068_v20  ;;  %v1248_v20 = vadd.f32 %v1247_v4, %v2377_v13  ;;  %v1328_v13 = vpop.xlane.xlu1 %1327 }
 0x34a   :  { %1350 = vmatprep.subr.bf16.mxu1 %v3069_v0  ;;  %v1262_v36 = vadd.f32 %v1261_v57, %v2371_v37  ;;  %v1240_v0 = vadd.f32 %v1239_v8, %v3006_v43  ;;  %1474 = vrcp.f32 %v1328_v13  ;;  %v1331_v43 = vpop.xlane.xlu0 %1330 }
 0x34b   :  { %v1263_v9 = vpop.f32.mrf.mxu0  ;;  %1476 = vrcp.f32 %v1331_v43 }
 0x34c   :  { %v1264_v11 = vadd.f32 %v1263_v9, %v2371_v37  ;;  %v1304_v31 = vpack.c.bf16 %v1262_v36, %v1258_v34  ;;  %v1301_v37 = vpack.c.bf16 %v1244_v47, %v1240_v0 }
 0x34d   :  { %v1267_v41 = vpop.f32.mrf.mxu0 }
 0x34e   :  { %v1268_v2 = vadd.f32 %v1267_v41, %v2369_v46  ;;  %v1305_v33 = vpack.c.bf16 %v1264_v11, %v1260_v32 }
 0x34f   :  { %v1269_v5 = vpop.f32.mrf.mxu0 }
 0x350   :  { %v1270_v7 = vadd.f32 %v1269_v5, %v2369_v46  ;;  %v1252_v46 = vadd.f32 %v1251_v44, %v2375_v15  ;;  %v1300_v15 = vpack.c.bf16 %v1242_v21, %v1238_v49  ;;  %v1299_v44 = vpack.c.bf16 %v1234_v23, %v1230_v58 }
 0x351   :  { %v1271_v56 = vpop.f32.mrf.mxu0  ;;  %1351 = vmatpush1.bf16.xpose.msra.mxu1 %v3070_v51 }
 0x352   :  { %v1272_v1 = vadd.f32 %v1271_v56, %v2367_v45  ;;  %v1302_v9 = vpack.c.bf16 %v1252_v46, %v1248_v20 }
 0x353   :  { %v1273_v59 = vpop.f32.mrf.mxu0 }
 0x354   :  { %v1274_v22 = vadd.f32 %v1273_v59, %v2367_v45  ;;  %v1306_v40 = vpack.c.bf16 %v1272_v1, %v1268_v2  ;;  %v1303_v45 = vpack.c.bf16 %v1254_v14, %v1250_v10 }
 0x356   :  { %v1307_v61 = vpack.c.bf16 %v1274_v22, %v1270_v7 }
 0x357   :  { %v1475_v26 = vpop.eup %1474 }
 0x358   :  { %1352 = vmatprep.subr.bf16.mxu1 %v1307_v61  ;;  %v1477_v55 = vpop.eup %1476 }
 0x359   :  { %1353 = vmatpush2.bf16.xpose.msra.mxu1 %v1306_v40 }
 0x35a   :  { %1354 = vmatprep.subr.bf16.mxu1 %v1305_v33 }
 0x361   :  { %1355 = vmatpush2.bf16.xpose.msra.mxu1 %v1304_v31 }
 0x362   :  { %1356 = vmatprep.subr.bf16.mxu1 %v1303_v45 }
 0x369   :  { %1357 = vmatpush2.bf16.xpose.msra.mxu1 %v1302_v9 }
 0x36a   :  { %1358 = vmatprep.subr.bf16.mxu1 %v1301_v37 }
 0x371   :  { %1359 = vmatpush2.bf16.xpose.msra.mxu1 %v1300_v15 }
 0x372   :  { %1360 = vmatprep.subr.bf16.mxu1 %v1299_v44 }
 0x379   :  { %1361 = vmatpush2.bf16.xpose.msra.mxu1 %v1298_v54 }
 0x37a   :  { %1362 = vmatprep.subr.bf16.mxu1 %v1297_v60 }
 0x381   :  { %1363 = vmatpush2.bf16.xpose.msra.mxu1 %v1296_v17 }
 0x382   :  { %1364 = vmatprep.subr.bf16.mxu1 %v1295_v50 }
 0x389   :  { %1365 = vmatpush2.bf16.xpose.msra.mxu1 %v1294_v42 }
 0x38a   :  { %1366 = vmatprep.subr.bf16.mxu1 %v1293_v28 }
 0x391   :  { %1367 = vmatpush2.bf16.xpose.msra.mxu1 %v1292_v35 }
 0x398   :  { %1369 = vmatmul.mubr.bf16.vlgmr.msra.gmra.mxu1 %v3073_v52 }
 0x458   :  { %v1370_v25 = vpop.f32.mrf.mxu1 }
 0x459   :  { %v1379_v12 = vmul.f32 %v1475_v26, %v1370_v25 }
 0x45a   :  { %v1372_v27 = vpop.f32.mrf.mxu1 }
 0x45b   :  { %1384 = vst [vmem:[#allocation5 + $0x20] sm:$0xff] %v1379_v12  ;;  %v1380_v42 = vmul.f32 %v1475_v26, %v1372_v27 }
 0x45c   :  { %v1374_v48 = vpop.f32.mrf.mxu1 }
 0x45d   :  { %1385 = vst [vmem:[#allocation5 + $0x28] sm:$0xff] %v1380_v42  ;;  %v1381_v53 = vmul.f32 %v1477_v55, %v1374_v48 }
 0x45e   :  { %v1376_v18 = vpop.f32.mrf.mxu1 }
 0x45f   :  { %1386 = vst [vmem:[#allocation5 + $0x30] sm:$0xff] %v1381_v53  ;;  %v1382_v35 = vmul.f32 %v1477_v55, %v1376_v18 }
 0x461   :  { %1387 = vst [vmem:[#allocation5 + $0x38] sm:$0xff] %v1382_v35 }
 0x462   :  { %1509 = shalt.err (!%p1506_p9)
}
 0x463   :  { %1399 = dma.vmem_to_hbm [thread:$0]  %s1394_s0, 1024, %s2840_s5, [#allocation4], %s1523_s21, %s1523_s21, %s1524_s22  }
 0x464   :  { %1520 = dma.done.wait [#allocation4], 1024  }
 0x465   :  { %1521 = vsyncadd [#allocation4], 4294966272 }
 0x466   :  { %1403 = vsyncpa [#allocation3], 1 }
 0x467   :  { %1404 = vsyncpa [#allocation4], 1 }

</bundles_post_ra>
